<compile_context>
chip_gen: v7x
topology: tpu7x:2x2x1
jax: 0.10.0
libtpu: 0.0.40
codegen_flags: <defaults>
</compile_context>

<pallas_src>
import functools

import jax
import jax.numpy as jnp
from jax.experimental import pallas as pl
from jax.experimental.pallas import tpu as pltpu


def _resconv_kernel(x_ref, prev_ref, next_ref, w_ref, b_ref, o_ref, xp_ref, *,
                    dilation, fused):
    # x_ref   : (1, TH, W, C)   current H tile (conv input AND residual)
    # prev_ref: (1, d,  W, C)   d rows just above the tile (clamped at border)
    # next_ref: (1, d,  W, C)   d rows just below the tile (clamped at border)
    # w_ref   : (9*C, C) if fused else (9, C, C)   beta-folded conv weights
    # b_ref   : (1, C)          beta-folded bias
    # o_ref   : (1, TH, W, C)   output tile
    # xp_ref  : (TH+2d, W+2d, C) VMEM scratch holding the zero-padded tile
    d = dilation
    _, TH, W, C = x_ref.shape
    i = pl.program_id(1)
    n_h = pl.num_programs(1)

    x = x_ref[0]                                      # (TH, W, C)
    # Halo rows; force them to zero on the first/last tile of the image
    # (the index maps clamp at the border, so the data there is a duplicate).
    top = prev_ref[0] * (i != 0).astype(x.dtype)
    bot = next_ref[0] * (i != n_h - 1).astype(x.dtype)

    # Assemble the zero-padded tile in VMEM (replaces any wrapper-side pad).
    zcol = jnp.zeros((TH + 2 * d, d, C), x.dtype)
    xp_ref[:, 0:d, :] = zcol                          # left  W border
    xp_ref[:, d + W:2 * d + W, :] = zcol              # right W border
    xp_ref[0:d, d:d + W, :] = top
    xp_ref[d:d + TH, d:d + W, :] = x
    xp_ref[d + TH:2 * d + TH, d:d + W, :] = bot

    # The nine shifted 3x3 taps, each flattened to (TH*W, C).  Channels stay
    # on the lane axis; the W shifts are cheap (addressed VMEM loads).
    taps = [
        xp_ref[kh * d:kh * d + TH, kw * d:kw * d + W, :].reshape(TH * W, C)
        for kh in range(3) for kw in range(3)
    ]

    if fused:
        # Lane-aligned channels: one big-K matmul (TH*W, 9C) @ (9C, C) keeps
        # the MXU full instead of nine K=C matmuls.
        pat = jnp.concatenate(taps, axis=-1)          # (TH*W, 9C)
        acc = jnp.dot(pat, w_ref[...], preferred_element_type=jnp.float32)
    else:
        # C not a multiple of 128: accumulate nine per-tap matmuls (K = C).
        acc = jnp.zeros((TH * W, C), jnp.float32)
        for k in range(9):
            acc = acc + jnp.dot(taps[k], w_ref[k],
                                preferred_element_type=jnp.float32)

    out = acc + b_ref[0].astype(jnp.float32) \
              + x.reshape(TH * W, C).astype(jnp.float32)     # residual
    out = jnp.where(out >= 0, out, 0.2 * out)                # LeakyReLU(0.2)
    # NOTE: for C < 128 this is a masked (partial-lane) store; a lane-dense
    # (TH, W*C) layout would need a cross-lane relayout of the matmul result,
    # which costs more than the masking here.
    o_ref[0] = out.reshape(TH, W, C).astype(o_ref.dtype)


def _pick_tile_h(H, W, C, d, itemsize=4, vmem_budget=8 * 1024 * 1024):
    """Largest divisor of H (multiple of d) whose working set fits the budget."""
    per_row = (W + 2 * d) * C * itemsize
    max_rows = max(d, vmem_budget // (14 * per_row))   # ~14 tile-sized live slabs
    cands = [t for t in range(d, H + 1) if H % t == 0 and t % d == 0]
    fits = [t for t in cands if t <= max_rows]
    if fits:
        return max(fits)
    return min(cands) if cands else H


def resconv_pallas(x_nchw, weight, bias, beta, *, dilation=1, tile_h=None):
    """ResConv forward: leaky_relu(conv3x3_dilated(x) * beta + x, 0.2).

    x_nchw: (N, C, H, W); weight: (C, C, 3, 3) OIHW; bias/beta: (C,) or (1,C,1,1).
    """
    N, C, H, W = x_nchw.shape
    d = int(dilation)
    assert H % d == 0, "H must be a multiple of the dilation"

    if tile_h is None:
        tile_h = _pick_tile_h(H, W, C, d, x_nchw.dtype.itemsize)
    assert H % tile_h == 0 and tile_h % d == 0
    n_h = H // tile_h
    hb = tile_h // d                      # tile height in units of halo blocks

    # Glue (layout only): NCHW -> NHWC so channels sit on the TPU lane axis.
    x_nhwc = jnp.transpose(x_nchw, (0, 2, 3, 1))

    # Fold beta into the conv weights / bias.
    beta = beta.reshape(-1)
    bias = bias.reshape(-1)
    # (C_out, C_in, 3, 3) -> (3, 3, C_in, C_out) -> (9, C_in, C_out), scaled by beta.
    w_taps = jnp.transpose(weight, (2, 3, 1, 0)).reshape(9, C, C) * beta[None, None, :]
    b_fold = (bias * beta).reshape(1, C)

    fused = (C % 128 == 0)                # lane-aligned tap concat -> one big-K matmul
    if fused:
        w_arg = w_taps.reshape(9 * C, C)
        w_spec = pl.BlockSpec((9 * C, C), lambda n, i: (0, 0))
    else:
        w_arg = w_taps
        w_spec = pl.BlockSpec((9, C, C), lambda n, i: (0, 0, 0))

    kernel = functools.partial(_resconv_kernel, dilation=d, fused=fused)

    out_nhwc = pl.pallas_call(
        kernel,
        out_shape=jax.ShapeDtypeStruct((N, H, W, C), x_nchw.dtype),
        grid_spec=pltpu.PrefetchScalarGridSpec(
            num_scalar_prefetch=0,
            grid=(N, n_h),
            in_specs=[
                # Main tile (also the residual).
                pl.BlockSpec((1, tile_h, W, C), lambda n, i: (n, i, 0, 0)),
                # d-row halo above / below the tile: same array, block size d
                # along H, clamped at the image borders (the kernel zeroes the
                # clamped copies on edge tiles).
                pl.BlockSpec((1, d, W, C),
                             lambda n, i: (n, jnp.maximum(i * hb - 1, 0), 0, 0)),
                pl.BlockSpec((1, d, W, C),
                             lambda n, i: (n, jnp.minimum((i + 1) * hb, H // d - 1),
                                           0, 0)),
                w_spec,
                pl.BlockSpec((1, C), lambda n, i: (0, 0)),
            ],
            out_specs=pl.BlockSpec((1, tile_h, W, C), lambda n, i: (n, i, 0, 0)),
            scratch_shapes=[
                pltpu.VMEM((tile_h + 2 * d, W + 2 * d, C), x_nchw.dtype),
            ],
        ),
        compiler_params=pltpu.CompilerParams(
            dimension_semantics=("parallel", "parallel")),
    )(x_nhwc, x_nhwc, x_nhwc, w_arg, b_fold)

    return jnp.transpose(out_nhwc, (0, 3, 1, 2))      # back to NCHW


def convblock_pallas(x_nchw, weights, biases, betas, *, dilation=1, tile_h=None):
    """IFBlock.convblock core: a chain of ResConv blocks (8 in IFNet)."""
    for w, b, bt in zip(weights, biases, betas):
        x_nchw = resconv_pallas(x_nchw, w, b, bt, dilation=dilation, tile_h=tile_h)
    return x_nchw


def resconv_reference(x_nchw, weight, bias, beta, *, dilation=1):
    """Pure-JAX reference matching the PyTorch ResConv semantics."""
    conv = jax.lax.conv_general_dilated(
        x_nchw, weight,
        window_strides=(1, 1),
        padding=((dilation, dilation), (dilation, dilation)),
        rhs_dilation=(dilation, dilation),
        dimension_numbers=("NCHW", "OIHW", "NCHW"),
    ) + bias.reshape(1, -1, 1, 1)
    y = conv * beta.reshape(1, -1, 1, 1) + x_nchw
    return jnp.where(y >= 0, y, 0.2 * y)


if __name__ == "__main__":
    # --- single ResConv configs (per-tap path, fused big-K path, dilation) ---
    configs = [
        # (N, C, H, W, dilation, tile_h)
        (2, 48, 16, 16, 1, 8),    # per-tap path (C % 128 != 0), 2 H tiles (halo)
        (1, 128, 16, 16, 1, 8),   # fused big-K path (C % 128 == 0)
        (1, 48, 16, 16, 2, 8),    # dilation = 2 (d-wide halo / shifts)
    ]
    for (N, C, H, W, d, th) in configs:
        key = jax.random.PRNGKey(0)
        kx, kwt, kb, kbt = jax.random.split(key, 4)
        x = jax.random.normal(kx, (N, C, H, W), dtype=jnp.float32)
        weight = jax.random.normal(kwt, (C, C, 3, 3), dtype=jnp.float32) * 0.1
        bias = jax.random.normal(kb, (C,), dtype=jnp.float32) * 0.1
        beta = 1.0 + 0.1 * jax.random.normal(kbt, (C,), dtype=jnp.float32)

        out = resconv_pallas(x, weight, bias, beta, dilation=d, tile_h=th)
        out = jax.block_until_ready(out)
        ref = resconv_reference(x, weight, bias, beta, dilation=d)

        assert out.shape == ref.shape
        err = float(jnp.max(jnp.abs(out - ref)))
        tol = 5e-2 * (1.0 + float(jnp.max(jnp.abs(ref))))
        # Default TPU matmul precision (bf16 passes) plus the beta-folding
        # reorders rounding, so compare with a correspondingly loose tolerance.
        assert err < tol, f"mismatch for {(N, C, H, W, d)}: max abs err {err}"

    # --- 8x ResConv chain (the IFBlock.convblock core path) ---
    N, C, H, W, d, th = 1, 48, 16, 16, 1, 8
    keys = jax.random.split(jax.random.PRNGKey(0), 1 + 3 * 8)
    x = jax.random.normal(keys[0], (N, C, H, W), dtype=jnp.float32)
    ws, bs, bts = [], [], []
    for l in range(8):
        ws.append(jax.random.normal(keys[1 + 3 * l], (C, C, 3, 3),
                                    dtype=jnp.float32) * 0.05)
        bs.append(jax.random.normal(keys[2 + 3 * l], (C,), dtype=jnp.float32) * 0.1)
        bts.append(1.0 + 0.05 * jax.random.normal(keys[3 + 3 * l], (C,),
                                                  dtype=jnp.float32))
    out = convblock_pallas(x, ws, bs, bts, dilation=d, tile_h=th)
    out = jax.block_until_ready(out)
    ref = x
    for l in range(8):
        ref = resconv_reference(ref, ws[l], bs[l], bts[l], dilation=d)
    err = float(jnp.max(jnp.abs(out - ref)))
    tol = 5e-2 * (1.0 + float(jnp.max(jnp.abs(ref))))
    assert out.shape == ref.shape
    assert err < tol, f"convblock chain mismatch: max abs err {err} (tol {tol})"

    print("KERNEL_OK")
</pallas_src>

<mosaic_0001>
module attributes {stable_mosaic.version = 11 : i64} {
  func.func @_resconv_kernel(%arg0: i32, %arg1: i32, %arg2: memref<1x8x16x48xf32, #tpu.memory_space<vmem>>, %arg3: memref<1x1x16x48xf32, #tpu.memory_space<vmem>>, %arg4: memref<1x1x16x48xf32, #tpu.memory_space<vmem>>, %arg5: memref<9x48x48xf32, #tpu.memory_space<vmem>>, %arg6: memref<1x48xf32, #tpu.memory_space<vmem>>, %arg7: memref<1x8x16x48xf32, #tpu.memory_space<vmem>>, %arg8: memref<10x18x48xf32, #tpu.memory_space<vmem>>) attributes {dimension_semantics = [#tpu.dimension_semantics<parallel>, #tpu.dimension_semantics<parallel>], iteration_bounds = array<i64: 2, 2>, scalar_prefetch = 0 : i64, scratch_operands = 1 : i64, tpu.core_type = #tpu.core_type<tc>, window_params = [{transform_indices = @transform_0, window_bounds = array<i64: 1, 8, 16, 48>}, {transform_indices = @transform_1, window_bounds = array<i64: 1, 1, 16, 48>}, {transform_indices = @transform_2, window_bounds = array<i64: 1, 1, 16, 48>}, {pipeline_mode = #tpu.pipeline_mode<synchronous>, transform_indices = @transform_3, window_bounds = array<i64: 9, 48, 48>}, {pipeline_mode = #tpu.pipeline_mode<synchronous>, transform_indices = @transform_4, window_bounds = array<i64: 1, 48>}, {transform_indices = @transform_5, window_bounds = array<i64: 1, 8, 16, 48>}]} {
    %c0 = arith.constant 0 : index
    %c0_0 = arith.constant 0 : index
    %c0_1 = arith.constant 0 : index
    %c0_2 = arith.constant 0 : index
    %0 = vector.load %arg2[%c0, %c0_0, %c0_1, %c0_2] : memref<1x8x16x48xf32, #tpu.memory_space<vmem>>, vector<1x8x16x48xf32>
    %1 = vector.shape_cast %0 : vector<1x8x16x48xf32> to vector<8x16x48xf32>
    %c0_3 = arith.constant 0 : index
    %c0_4 = arith.constant 0 : index
    %c0_5 = arith.constant 0 : index
    %c0_6 = arith.constant 0 : index
    %2 = vector.load %arg3[%c0_3, %c0_4, %c0_5, %c0_6] : memref<1x1x16x48xf32, #tpu.memory_space<vmem>>, vector<1x1x16x48xf32>
    %3 = vector.shape_cast %2 : vector<1x1x16x48xf32> to vector<1x16x48xf32>
    %c0_i32 = arith.constant 0 : i32
    %4 = arith.cmpi ne, %arg1, %c0_i32 : i32
    %5 = arith.extui %4 : i1 to i32
    %6 = arith.sitofp %5 : i32 to f32
    %7 = vector.broadcast %6 : f32 to vector<1x16x48xf32>
    %8 = arith.mulf %3, %7 : vector<1x16x48xf32>
    %c0_7 = arith.constant 0 : index
    %c0_8 = arith.constant 0 : index
    %c0_9 = arith.constant 0 : index
    %c0_10 = arith.constant 0 : index
    %9 = vector.load %arg4[%c0_7, %c0_8, %c0_9, %c0_10] : memref<1x1x16x48xf32, #tpu.memory_space<vmem>>, vector<1x1x16x48xf32>
    %10 = vector.shape_cast %9 : vector<1x1x16x48xf32> to vector<1x16x48xf32>
    %c1_i32 = arith.constant 1 : i32
    %11 = arith.cmpi ne, %arg1, %c1_i32 : i32
    %12 = arith.extui %11 : i1 to i32
    %13 = arith.sitofp %12 : i32 to f32
    %14 = vector.broadcast %13 : f32 to vector<1x16x48xf32>
    %15 = arith.mulf %10, %14 : vector<1x16x48xf32>
    %cst = arith.constant 0.000000e+00 : f32
    %16 = vector.broadcast %cst : f32 to vector<10x1x48xf32>
    %c0_11 = arith.constant 0 : index
    %c0_12 = arith.constant 0 : index
    %c0_13 = arith.constant 0 : index
    %17 = vector.load %arg8[%c0_11, %c0_12, %c0_13] : memref<10x18x48xf32, #tpu.memory_space<vmem>>, vector<10x1x48xf32>
    tpu.vector_store %arg8[%c0_11, %c0_12, %c0_13], %16 {strides = array<i32>} : memref<10x18x48xf32, #tpu.memory_space<vmem>>, vector<10x1x48xf32>,
    %c0_14 = arith.constant 0 : index
    %c17 = arith.constant 17 : index
    %c0_15 = arith.constant 0 : index
    %18 = vector.load %arg8[%c0_14, %c17, %c0_15] : memref<10x18x48xf32, #tpu.memory_space<vmem>>, vector<10x1x48xf32>
    tpu.vector_store %arg8[%c0_14, %c17, %c0_15], %16 {strides = array<i32>} : memref<10x18x48xf32, #tpu.memory_space<vmem>>, vector<10x1x48xf32>,
    %c0_16 = arith.constant 0 : index
    %c1 = arith.constant 1 : index
    %c0_17 = arith.constant 0 : index
    %19 = vector.load %arg8[%c0_16, %c1, %c0_17] : memref<10x18x48xf32, #tpu.memory_space<vmem>>, vector<1x16x48xf32>
    tpu.vector_store %arg8[%c0_16, %c1, %c0_17], %8 {strides = array<i32>} : memref<10x18x48xf32, #tpu.memory_space<vmem>>, vector<1x16x48xf32>,
    %c1_18 = arith.constant 1 : index
    %c1_19 = arith.constant 1 : index
    %c0_20 = arith.constant 0 : index
    %20 = vector.load %arg8[%c1_18, %c1_19, %c0_20] : memref<10x18x48xf32, #tpu.memory_space<vmem>>, vector<8x16x48xf32>
    tpu.vector_store %arg8[%c1_18, %c1_19, %c0_20], %1 {strides = array<i32>} : memref<10x18x48xf32, #tpu.memory_space<vmem>>, vector<8x16x48xf32>,
    %c9 = arith.constant 9 : index
    %c1_21 = arith.constant 1 : index
    %c0_22 = arith.constant 0 : index
    %21 = vector.load %arg8[%c9, %c1_21, %c0_22] : memref<10x18x48xf32, #tpu.memory_space<vmem>>, vector<1x16x48xf32>
    tpu.vector_store %arg8[%c9, %c1_21, %c0_22], %15 {strides = array<i32>} : memref<10x18x48xf32, #tpu.memory_space<vmem>>, vector<1x16x48xf32>,
    %c0_23 = arith.constant 0 : index
    %c0_24 = arith.constant 0 : index
    %c0_25 = arith.constant 0 : index
    %22 = vector.load %arg8[%c0_23, %c0_24, %c0_25] : memref<10x18x48xf32, #tpu.memory_space<vmem>>, vector<8x16x48xf32>
    %23 = vector.shape_cast %22 : vector<8x16x48xf32> to vector<128x48xf32>
    %c0_26 = arith.constant 0 : index
    %c1_27 = arith.constant 1 : index
    %c0_28 = arith.constant 0 : index
    %24 = vector.load %arg8[%c0_26, %c1_27, %c0_28] : memref<10x18x48xf32, #tpu.memory_space<vmem>>, vector<8x16x48xf32>
    %25 = vector.shape_cast %24 : vector<8x16x48xf32> to vector<128x48xf32>
    %c0_29 = arith.constant 0 : index
    %c2 = arith.constant 2 : index
    %c0_30 = arith.constant 0 : index
    %26 = vector.load %arg8[%c0_29, %c2, %c0_30] : memref<10x18x48xf32, #tpu.memory_space<vmem>>, vector<8x16x48xf32>
    %27 = vector.shape_cast %26 : vector<8x16x48xf32> to vector<128x48xf32>
    %c1_31 = arith.constant 1 : index
    %c0_32 = arith.constant 0 : index
    %c0_33 = arith.constant 0 : index
    %28 = vector.load %arg8[%c1_31, %c0_32, %c0_33] : memref<10x18x48xf32, #tpu.memory_space<vmem>>, vector<8x16x48xf32>
    %29 = vector.shape_cast %28 : vector<8x16x48xf32> to vector<128x48xf32>
    %c1_34 = arith.constant 1 : index
    %c1_35 = arith.constant 1 : index
    %c0_36 = arith.constant 0 : index
    %30 = vector.load %arg8[%c1_34, %c1_35, %c0_36] : memref<10x18x48xf32, #tpu.memory_space<vmem>>, vector<8x16x48xf32>
    %31 = vector.shape_cast %30 : vector<8x16x48xf32> to vector<128x48xf32>
    %c1_37 = arith.constant 1 : index
    %c2_38 = arith.constant 2 : index
    %c0_39 = arith.constant 0 : index
    %32 = vector.load %arg8[%c1_37, %c2_38, %c0_39] : memref<10x18x48xf32, #tpu.memory_space<vmem>>, vector<8x16x48xf32>
    %33 = vector.shape_cast %32 : vector<8x16x48xf32> to vector<128x48xf32>
    %c2_40 = arith.constant 2 : index
    %c0_41 = arith.constant 0 : index
    %c0_42 = arith.constant 0 : index
    %34 = vector.load %arg8[%c2_40, %c0_41, %c0_42] : memref<10x18x48xf32, #tpu.memory_space<vmem>>, vector<8x16x48xf32>
    %35 = vector.shape_cast %34 : vector<8x16x48xf32> to vector<128x48xf32>
    %c2_43 = arith.constant 2 : index
    %c1_44 = arith.constant 1 : index
    %c0_45 = arith.constant 0 : index
    %36 = vector.load %arg8[%c2_43, %c1_44, %c0_45] : memref<10x18x48xf32, #tpu.memory_space<vmem>>, vector<8x16x48xf32>
    %37 = vector.shape_cast %36 : vector<8x16x48xf32> to vector<128x48xf32>
    %c2_46 = arith.constant 2 : index
    %c2_47 = arith.constant 2 : index
    %c0_48 = arith.constant 0 : index
    %38 = vector.load %arg8[%c2_46, %c2_47, %c0_48] : memref<10x18x48xf32, #tpu.memory_space<vmem>>, vector<8x16x48xf32>
    %39 = vector.shape_cast %38 : vector<8x16x48xf32> to vector<128x48xf32>
    %cst_49 = arith.constant 0.000000e+00 : f32
    %40 = vector.broadcast %cst_49 : f32 to vector<128x48xf32>
    %c0_50 = arith.constant 0 : index
    %c0_51 = arith.constant 0 : index
    %c0_52 = arith.constant 0 : index
    %41 = vector.load %arg5[%c0_50, %c0_51, %c0_52] : memref<9x48x48xf32, #tpu.memory_space<vmem>>, vector<1x48x48xf32>
    %42 = vector.shape_cast %41 : vector<1x48x48xf32> to vector<48x48xf32>
    %cst_53 = arith.constant dense<0.000000e+00> : vector<128x48xf32>
    %43 = tpu.matmul %23, %42, %cst_53 {dimension_numbers = #tpu.dot_dimension_numbers<[1], [0], [0], [1], [0, 0, 1, 1], [], []>} : vector<128x48xf32>, vector<48x48xf32>, vector<128x48xf32> -> vector<128x48xf32>
    %44 = arith.addf %40, %43 : vector<128x48xf32>
    %c1_54 = arith.constant 1 : index
    %c0_55 = arith.constant 0 : index
    %c0_56 = arith.constant 0 : index
    %45 = vector.load %arg5[%c1_54, %c0_55, %c0_56] : memref<9x48x48xf32, #tpu.memory_space<vmem>>, vector<1x48x48xf32>
    %46 = vector.shape_cast %45 : vector<1x48x48xf32> to vector<48x48xf32>
    %cst_57 = arith.constant dense<0.000000e+00> : vector<128x48xf32>
    %47 = tpu.matmul %25, %46, %cst_57 {dimension_numbers = #tpu.dot_dimension_numbers<[1], [0], [0], [1], [0, 0, 1, 1], [], []>} : vector<128x48xf32>, vector<48x48xf32>, vector<128x48xf32> -> vector<128x48xf32>
    %48 = arith.addf %44, %47 : vector<128x48xf32>
    %c2_58 = arith.constant 2 : index
    %c0_59 = arith.constant 0 : index
    %c0_60 = arith.constant 0 : index
    %49 = vector.load %arg5[%c2_58, %c0_59, %c0_60] : memref<9x48x48xf32, #tpu.memory_space<vmem>>, vector<1x48x48xf32>
    %50 = vector.shape_cast %49 : vector<1x48x48xf32> to vector<48x48xf32>
    %cst_61 = arith.constant dense<0.000000e+00> : vector<128x48xf32>
    %51 = tpu.matmul %27, %50, %cst_61 {dimension_numbers = #tpu.dot_dimension_numbers<[1], [0], [0], [1], [0, 0, 1, 1], [], []>} : vector<128x48xf32>, vector<48x48xf32>, vector<128x48xf32> -> vector<128x48xf32>
    %52 = arith.addf %48, %51 : vector<128x48xf32>
    %c3 = arith.constant 3 : index
    %c0_62 = arith.constant 0 : index
    %c0_63 = arith.constant 0 : index
    %53 = vector.load %arg5[%c3, %c0_62, %c0_63] : memref<9x48x48xf32, #tpu.memory_space<vmem>>, vector<1x48x48xf32>
    %54 = vector.shape_cast %53 : vector<1x48x48xf32> to vector<48x48xf32>
    %cst_64 = arith.constant dense<0.000000e+00> : vector<128x48xf32>
    %55 = tpu.matmul %29, %54, %cst_64 {dimension_numbers = #tpu.dot_dimension_numbers<[1], [0], [0], [1], [0, 0, 1, 1], [], []>} : vector<128x48xf32>, vector<48x48xf32>, vector<128x48xf32> -> vector<128x48xf32>
    %56 = arith.addf %52, %55 : vector<128x48xf32>
    %c4 = arith.constant 4 : index
    %c0_65 = arith.constant 0 : index
    %c0_66 = arith.constant 0 : index
    %57 = vector.load %arg5[%c4, %c0_65, %c0_66] : memref<9x48x48xf32, #tpu.memory_space<vmem>>, vector<1x48x48xf32>
    %58 = vector.shape_cast %57 : vector<1x48x48xf32> to vector<48x48xf32>
    %cst_67 = arith.constant dense<0.000000e+00> : vector<128x48xf32>
    %59 = tpu.matmul %31, %58, %cst_67 {dimension_numbers = #tpu.dot_dimension_numbers<[1], [0], [0], [1], [0, 0, 1, 1], [], []>} : vector<128x48xf32>, vector<48x48xf32>, vector<128x48xf32> -> vector<128x48xf32>
    %60 = arith.addf %56, %59 : vector<128x48xf32>
    %c5 = arith.constant 5 : index
    %c0_68 = arith.constant 0 : index
    %c0_69 = arith.constant 0 : index
    %61 = vector.load %arg5[%c5, %c0_68, %c0_69] : memref<9x48x48xf32, #tpu.memory_space<vmem>>, vector<1x48x48xf32>
    %62 = vector.shape_cast %61 : vector<1x48x48xf32> to vector<48x48xf32>
    %cst_70 = arith.constant dense<0.000000e+00> : vector<128x48xf32>
    %63 = tpu.matmul %33, %62, %cst_70 {dimension_numbers = #tpu.dot_dimension_numbers<[1], [0], [0], [1], [0, 0, 1, 1], [], []>} : vector<128x48xf32>, vector<48x48xf32>, vector<128x48xf32> -> vector<128x48xf32>
    %64 = arith.addf %60, %63 : vector<128x48xf32>
    %c6 = arith.constant 6 : index
    %c0_71 = arith.constant 0 : index
    %c0_72 = arith.constant 0 : index
    %65 = vector.load %arg5[%c6, %c0_71, %c0_72] : memref<9x48x48xf32, #tpu.memory_space<vmem>>, vector<1x48x48xf32>
    %66 = vector.shape_cast %65 : vector<1x48x48xf32> to vector<48x48xf32>
    %cst_73 = arith.constant dense<0.000000e+00> : vector<128x48xf32>
    %67 = tpu.matmul %35, %66, %cst_73 {dimension_numbers = #tpu.dot_dimension_numbers<[1], [0], [0], [1], [0, 0, 1, 1], [], []>} : vector<128x48xf32>, vector<48x48xf32>, vector<128x48xf32> -> vector<128x48xf32>
    %68 = arith.addf %64, %67 : vector<128x48xf32>
    %c7 = arith.constant 7 : index
    %c0_74 = arith.constant 0 : index
    %c0_75 = arith.constant 0 : index
    %69 = vector.load %arg5[%c7, %c0_74, %c0_75] : memref<9x48x48xf32, #tpu.memory_space<vmem>>, vector<1x48x48xf32>
    %70 = vector.shape_cast %69 : vector<1x48x48xf32> to vector<48x48xf32>
    %cst_76 = arith.constant dense<0.000000e+00> : vector<128x48xf32>
    %71 = tpu.matmul %37, %70, %cst_76 {dimension_numbers = #tpu.dot_dimension_numbers<[1], [0], [0], [1], [0, 0, 1, 1], [], []>} : vector<128x48xf32>, vector<48x48xf32>, vector<128x48xf32> -> vector<128x48xf32>
    %72 = arith.addf %68, %71 : vector<128x48xf32>
    %c8 = arith.constant 8 : index
    %c0_77 = arith.constant 0 : index
    %c0_78 = arith.constant 0 : index
    %73 = vector.load %arg5[%c8, %c0_77, %c0_78] : memref<9x48x48xf32, #tpu.memory_space<vmem>>, vector<1x48x48xf32>
    %74 = vector.shape_cast %73 : vector<1x48x48xf32> to vector<48x48xf32>
    %cst_79 = arith.constant dense<0.000000e+00> : vector<128x48xf32>
    %75 = tpu.matmul %39, %74, %cst_79 {dimension_numbers = #tpu.dot_dimension_numbers<[1], [0], [0], [1], [0, 0, 1, 1], [], []>} : vector<128x48xf32>, vector<48x48xf32>, vector<128x48xf32> -> vector<128x48xf32>
    %76 = arith.addf %72, %75 : vector<128x48xf32>
    %c0_80 = arith.constant 0 : index
    %c0_81 = arith.constant 0 : index
    %77 = vector.load %arg6[%c0_80, %c0_81] : memref<1x48xf32, #tpu.memory_space<vmem>>, vector<1x48xf32>
    %78 = vector.shape_cast %77 : vector<1x48xf32> to vector<48xf32>
    %79 = vector.shape_cast %78 : vector<48xf32> to vector<1x48xf32>
    %80 = vector.broadcast %79 : vector<1x48xf32> to vector<128x48xf32>
    %81 = arith.addf %76, %80 : vector<128x48xf32>
    %82 = vector.shape_cast %1 : vector<8x16x48xf32> to vector<128x48xf32>
    %83 = arith.addf %81, %82 : vector<128x48xf32>
    %cst_82 = arith.constant 0.000000e+00 : f32
    %84 = vector.broadcast %cst_82 : f32 to vector<128x48xf32>
    %85 = arith.cmpf oge, %83, %84 : vector<128x48xf32>
    %cst_83 = arith.constant 2.000000e-01 : f32
    %86 = vector.broadcast %cst_83 : f32 to vector<128x48xf32>
    %87 = arith.mulf %86, %83 : vector<128x48xf32>
    %88 = arith.select %85, %83, %87 : vector<128x48xi1>, vector<128x48xf32>
    %89 = vector.shape_cast %88 : vector<128x48xf32> to vector<8x16x48xf32>
    %c0_84 = arith.constant 0 : index
    %c0_85 = arith.constant 0 : index
    %c0_86 = arith.constant 0 : index
    %c0_87 = arith.constant 0 : index
    %90 = vector.load %arg7[%c0_84, %c0_85, %c0_86, %c0_87] : memref<1x8x16x48xf32, #tpu.memory_space<vmem>>, vector<1x8x16x48xf32>
    %91 = vector.shape_cast %90 : vector<1x8x16x48xf32> to vector<8x16x48xf32>
    %92 = vector.shape_cast %89 : vector<8x16x48xf32> to vector<1x8x16x48xf32>
    tpu.vector_store %arg7[%c0_84, %c0_85, %c0_86, %c0_87], %92 {strides = array<i32>} : memref<1x8x16x48xf32, #tpu.memory_space<vmem>>, vector<1x8x16x48xf32>,
    return
  }
  func.func @transform_0(%arg0: i32, %arg1: i32) -> (i32, i32, i32, i32) {
    %c0_i32 = arith.constant 0 : i32
    %c0_i32_0 = arith.constant 0 : i32
    %c0_i32_1 = arith.constant 0 : i32
    return %arg0, %arg1, %c0_i32, %c0_i32_0 : i32, i32, i32, i32
  }
  func.func @transform_1(%arg0: i32, %arg1: i32) -> (i32, i32, i32, i32) {
    %c8_i32 = arith.constant 8 : i32
    %0 = arith.muli %arg1, %c8_i32 : i32
    %c1_i32 = arith.constant 1 : i32
    %1 = arith.subi %0, %c1_i32 : i32
    %c0_i32 = arith.constant 0 : i32
    %2 = arith.maxsi %1, %c0_i32 : i32
    %c0_i32_0 = arith.constant 0 : i32
    %c0_i32_1 = arith.constant 0 : i32
    %c0_i32_2 = arith.constant 0 : i32
    return %arg0, %2, %c0_i32_0, %c0_i32_1 : i32, i32, i32, i32
  }
  func.func @transform_2(%arg0: i32, %arg1: i32) -> (i32, i32, i32, i32) {
    %c1_i32 = arith.constant 1 : i32
    %0 = arith.addi %arg1, %c1_i32 : i32
    %c8_i32 = arith.constant 8 : i32
    %1 = arith.muli %0, %c8_i32 : i32
    %c15_i32 = arith.constant 15 : i32
    %2 = arith.minsi %1, %c15_i32 : i32
    %c0_i32 = arith.constant 0 : i32
    %c0_i32_0 = arith.constant 0 : i32
    %c0_i32_1 = arith.constant 0 : i32
    return %arg0, %2, %c0_i32, %c0_i32_0 : i32, i32, i32, i32
  }
  func.func @transform_3(%arg0: i32, %arg1: i32) -> (i32, i32, i32) {
    %c0_i32 = arith.constant 0 : i32
    %c0_i32_0 = arith.constant 0 : i32
    %c0_i32_1 = arith.constant 0 : i32
    %c0_i32_2 = arith.constant 0 : i32
    return %c0_i32, %c0_i32_0, %c0_i32_1 : i32, i32, i32
  }
  func.func @transform_4(%arg0: i32, %arg1: i32) -> (i32, i32) {
    %c0_i32 = arith.constant 0 : i32
    %c0_i32_0 = arith.constant 0 : i32
    %c0_i32_1 = arith.constant 0 : i32
    return %c0_i32, %c0_i32_0 : i32, i32
  }
  func.func @transform_5(%arg0: i32, %arg1: i32) -> (i32, i32, i32, i32) {
    %c0_i32 = arith.constant 0 : i32
    %c0_i32_0 = arith.constant 0 : i32
    %c0_i32_1 = arith.constant 0 : i32
    return %arg0, %arg1, %c0_i32, %c0_i32_0 : i32, i32, i32, i32
  }
}

</mosaic_0001>

<bundles_post_ra>
// kernel: tpu_custom_call.1
= control target key start
LH: loop header
LB: loop body
LE: loop exit
PB: predicated region body
PF: predicated region fallthrough
CT: control target
= control target key end

     0   :  { %s5274_s0 = inlined_call_operand.hbm [shape: f32[2,16,16,48], index: 0, kind: input, shape index: {}]   ;;  %s5275_s1 = inlined_call_operand.hbm [shape: f32[2,16,16,48], index: 1, kind: input, shape index: {}]   ;;  %s5276_s2 = inlined_call_operand.hbm [shape: f32[2,16,16,48], index: 2, kind: input, shape index: {}]   ;;  %s5277_s3 = inlined_call_operand.hbm [shape: f32[9,48,48], index: 3, kind: input, shape index: {}]   ;;  %s5278_s4 = inlined_call_operand.vmem [shape: f32[1,48], index: 4, kind: input, shape index: {}]   ;;  %s5279_s5 = inlined_call_operand.hbm [shape: f32[2,16,16,48], index: 5, kind: output, shape index: {}]  }
   0x1   :  { %5313 = sst [smem:[#allocation40_spill]] %s5274_s0 }
   0x2   :  { %5314 = sst [smem:[#allocation41_spill]] %s5275_s1 }
   0x3   :  { %5315 = sst [smem:[#allocation42_spill]] %s5276_s2 }
   0x4   :  { %5316 = sst [smem:[#allocation43_spill]] %s5277_s3 }
   0x5   :  { %5317 = sst [smem:[#allocation44_spill]] %s5278_s4 }
   0x6   :  { %5318 = sst [smem:[#allocation45_spill]] %s5279_s5 }
   0x7   :  { %10 = vsyncpa [#allocation4], 0 }
   0x8   :  { %12 = vsyncpa [#allocation4 + $0x1], 0 }
   0x9   :  { %13 = vsyncpa [#allocation7], 0 }
   0xa   :  { %15 = vsyncpa [#allocation7 + $0x1], 0 }
   0xb   :  { %16 = vsyncpa [#allocation10], 0 }
   0xc   :  { %17 = vsyncpa [#allocation5], 0 }
   0xd   :  { %19 = vsyncpa [#allocation5 + $0x1], 0  ;;  %s4224_s18 = smov 0   ;;  %s4226_s19 = smov 0  }
   0xe   :  { %s4228_s20 = smov 0   ;;  %s4230_s21 = smov 0  }
   0xf   :  { %s4232_s22 = smov 0   ;;  %s4234_s23 = smov 0  }
  0x10   :  { %s4236_s24 = smov 0   ;;  %s4238_s25 = smov 0  }
  0x11   :  { %s4240_s26 = smov 0   ;;  %s4242_s27 = smov 0  }
  0x12   :  { %s4244_s28 = smov 0   ;;  %s4246_s29 = smov 0  }
  0x13   :  { %s4248_s30 = smov 0   ;;  %s4250_s6 = smov 0  }
  0x14 LB: > { %5319 = sst [smem:[#allocation17_spill]] %s4130_s18  ;;  %s34_s7 = sadd.s32 1, %s4174_s29  ;;  %s4182_s6 = sphi %s4250_s6, %s25_s6   ;;  %s4178_s30 = sphi %s4248_s30, %s5406_s30   ;;  %s4174_s29 = sphi %s4246_s29, %s5405_s29   ;;  %s4170_s28 = sphi %s4244_s28, %s5404_s28   ;;  %s4166_s27 = sphi %s4242_s27, %s5403_s27   ;;  %s4162_s26 = sphi %s4240_s26, %s5402_s26   ;;  %s4158_s25 = sphi %s4238_s25, %s5411_s25   ;;  %s4154_s24 = sphi %s4236_s24, %s5410_s24   ;;  %s4150_s23 = sphi %s4234_s23, %s5400_s23   ;;  %s4146_s22 = sphi %s4232_s22, %s5409_s22   ;;  %s4142_s21 = sphi %s4230_s21, %s5408_s21   ;;  %s4138_s20 = sphi %s4228_s20, %s5407_s20   ;;  %s4134_s19 = sphi %s4226_s19, %s5398_s19   ;;  %s4130_s18 = sphi %s4224_s18, %s5397_s18  }
  0x15   : > { %5320 = sst [smem:[#allocation18_spill]] %s4134_s19  ;;  %s37_s8 = sadd.s32 1, %s4178_s30 }
  0x16   : > { %5321 = sst [smem:[#allocation19_spill]] %s4138_s20  ;;  %p35_p0 = scmp.ge.s32.totalorder %s34_s7, 2 }
  0x17   : > { %5322 = sst [smem:[#allocation20_spill]] %s4150_s23  ;;  %p5291_p1 = scmp.eq.s32.totalorder %s4182_s6, 0 }
  0x18   : > { %5323 = sst [smem:[#allocation21_spill]] %s4162_s26  ;;  %s2799_s9 = sshll.u32 %s4174_s29, 3 }
  0x19   : > { %5324 = sst [smem:[#allocation22_spill]] %s4166_s27  ;;  %s82_s10 = sadd.s32 1, %s4150_s23 }
  0x1a   : > { %5325 = sst [smem:[#allocation23_spill]] %s4170_s28  ;;  %s5413_s7 = smov (%p35_p0, %s34_s7), 0 }
  0x1b   : > { %5326 = sst [smem:[#allocation24_spill]] %s4174_s29  ;;  %s5415_s8 = smov (!%p35_p0, %s37_s8), %s4178_s30 }
  0x1c   : > { %5327 = sst [smem:[#allocation25_spill]] %s4178_s30  ;;  %s42_s11 = ssub.s32 %s4174_s29, %s5413_s7 }
  0x1d   : > { %5328 = sst [smem:[#allocation26_spill]] %s5413_s7  ;;  %s2800_s12 = sadd.s32 4294967295, %s2799_s9 }
  0x1e   : > { %p39_p2 = scmp.ge.s32.totalorder %s5415_s8, 2  ;;  %p71_p3 = scmp.gt.s32.totalorder %s2800_s12, 0 }
  0x1f   : > { %s2801_s13 = sshll.u32 %s5413_s7, 3  ;;  %p89_p4 = scmp.ne.s32.totalorder %s4150_s23, %s4146_s22 }
  0x20   : > { %s5417_s8 = smov (%p39_p2, %s5415_s8), 0  ;;  %s5419_s12 = smov (!%p71_p3, %s2800_s12), 0 }
  0x21   : > { %5329 = sst [smem:[#allocation27_spill]] %s5417_s8  ;;  %s4311_s14 = ssub.s32 %s4178_s30, %s5417_s8 }
  0x22   : > { %5330 = sst [smem:[#allocation28_spill]] %s4311_s14  ;;  %s2802_s15 = sadd.s32 4294967295, %s2801_s13 }
  0x23   : > { %s4314_s16 = sor.u32 %s42_s11, %s4311_s14  ;;  %p75_p5 = scmp.gt.s32.totalorder %s2802_s15, 0 }
  0x24   : > { %p4319_p7 = por %p89_p4, %p5291_p1  ;;  %p95_p8 = scmp.ne.s32.totalorder %s4146_s22, %s4142_s21 }
  0x25   : > { %s5421_s15 = smov (!%p75_p5, %s2802_s15), 0  ;;  %s4325_s8 = sadd.s32 8, %s2799_s9 }
  0x26   : > { %5332 = sst [smem:[#allocation29_spill]] %s4325_s8  ;;  %s78_s7 = ssub.s32 %s5419_s12, %s5421_s15 }
  0x27   : > { %s79_s5 = sor.u32 %s78_s7, %s4311_s14  ;;  %s4329_s11 = sadd.s32 8, %s2801_s13 }
  0x28   : > { %p80_p10 = scmp.eq.s32.totalorder %s79_s5, 0  ;;  %p5290_p12 = scmp.lt.s32.totalorder %s4182_s6, 4 }
  0x29   : > { %s4337_s4 = sshll.u32 %s4178_s30, 5  ;;  %s265_s27 = sand.u32 1, %s4182_s6  }
  0x2a   : > { %s4333_s28 = scalar_select %p80_p10, %s4150_s23, %s82_s10  }
  0x2b   : > { %s267_s9 = sand.u32 1, %s4150_s23   ;;  %s2816_s18 = sshll.u32 %s5419_s12, 1 }
  0x2c   : > { %5333 = sst [smem:[#allocation30_spill]] %s4333_s28  ;;  %s2813_s2 = sshll.u32 %s267_s9, 4 }
  0x2d   : > { %s279_s15 = sadd.s32 %s2816_s18, %s4337_s4  ;;  %s269_s7 = scalar_lea.vmem [#allocation6], %s2813_s2 }
  0x2e   : > { %s2818_s19 = sshll.u32 %s279_s15, 7  ;;  %s282_s13 = sshll.u32 %s269_s7, 4  ;;  %s4347_s13 = int_to_ptr.vmem [resolvable:$true] %s282_s13 }
  0x2f   : > { %s5334_s1 = sld [smem:[#allocation41_spill]]  ;;  %p4353_p13 = pnand %p5290_p12, %p4319_p7 }
  0x30   : > { %s4357_s2 = scalar_lea.sflag [#allocation7], %s265_s27 }
  0x31   : > { %p3908_p2 = pneg %p4353_p13 }
  0x35   : > { %s4345_s20 = scalar_lea.hbm %s5334_s1, %s2818_s19  ;;  %s3911_s10 = scalar_lea.hbm %s5334_s1, 8192 }
  0x36   : > { %s3906_s18 = scalar_lea.hbm %s4345_s20, 256  ;;  %p3912_p5 = scmp.lt.u32.totalorder %s4345_s20, %s5334_s1 }
  0x37   : > { %p3907_p0 = scmp.ne.s32.totalorder %s4345_s20, %s3906_s18  ;;  %p3913_p7 = scmp.lt.u32.totalorder %s3911_s10, %s3906_s18 }
  0x38   : > { %p3915_p11 = scmp.lt.u32.totalorder %s3906_s18, %s4345_s20 }
  0x39   : > { %p3909_p3 = pnand %p3908_p2, %p3907_p0  ;;  %p3914_p10 = por %p3913_p7, %p3912_p5 }
  0x3b   : > { %p3910_p4 = pneg %p3909_p3  ;;  %p3916_p9 = por %p3915_p11, %p3914_p10 }
  0x3d   : > { %p3917_p12 = pnand %p3916_p9, %p3910_p4 }
  0x3f   : > { %3920 = shalt.err (!%p3917_p12)
}
  0x40   : > { %s3921_s27 = scalar_lea.vmem %s4347_s13, 256  ;;  %s4184_s17 = smov [#allocation6]  }
  0x41   : > { %p3922_p0 = scmp.ne.s32.totalorder %s4347_s13, %s3921_s27  ;;  %s3926_s9 = sshll.u32 %s4184_s17, 4  ;;  %s3927_s9 = int_to_ptr.vmem [resolvable:$false] %s3926_s9 }
  0x42   : > { %s3928_s15 = scalar_lea.vmem %s3927_s9, 512  ;;  %p3929_p6 = scmp.lt.s32.totalorder %s4347_s13, %s3927_s9 }
  0x43   : > { %p3924_p3 = pnand %p3922_p0, %p3908_p2  ;;  %p3930_p5 = scmp.lt.s32.totalorder %s3928_s15, %s3921_s27 }
  0x45   : > { %p3925_p1 = pneg %p3924_p3  ;;  %p3931_p7 = por %p3930_p5, %p3929_p6 }
  0x47   : > { %p3932_p11 = pnand %p3931_p7, %p3925_p1 }
  0x49   : > { %3935 = shalt.err (!%p3932_p11)
}
  0x4a   : > { %s5292_s7 = smov 128   ;;  %s5294_s18 = smov 8  }
  0x4b   : > { %3776 = dma.hbm_to_vmem [thread:$0]  (!%p4353_p13), %s4345_s20, 256, %s4347_s13, %s4357_s2, %s5292_s7, %s5292_s7, %s5294_s18  }
  0x4c   : > { %s4389_s19 = sadd.s32 4294967295, %s4182_s6   ;;  %p2805_p1 = scmp.ge.s32.totalorder %s4182_s6, 1 }
  0x4d   : > { %p5296_p6 = scmp.eq.s32.totalorder %s4389_s19, 0  ;;  %p212_p12 = scmp.lt.s32.totalorder %s4182_s6, 5 }
  0x4e   : > { %s4187_s20 = smov [#allocation9]   ;;  %s2798_s21 = sadd.s32 4294967294, %s4182_s6  }
  0x4f   : > { %p4400_p2 = por %p95_p8, %p5296_p6  ;;  %p4404_p4 = pnand %p2805_p1, %p212_p12 }
  0x50   : > { %s224_s13 = sshll.u32 %s4187_s20, 4  ;;  %s46_s12 = sadd.s32 1, %s4162_s26  ;;  %s225_s13 = int_to_ptr.vmem [resolvable:$true] %s224_s13 }
  0x51   : > { %s5336_s8 = scalar_select %p4400_p2, 1, 0 }
  0x52   : > { %s5337_s5 = scalar_select %p4404_p4, 1, 0 }
  0x53   : > { %p3766_p13 = pneg %p4404_p4  ;;  %s5339_s3 = sld [smem:[#allocation43_spill]] }
  0x55   : > { %p4412_p10 = pnand %p3766_p13, %p5296_p6 }
  0x57   : > { %p3938_p0 = pneg %p4412_p10 }
  0x59   : > { %s3936_s17 = scalar_lea.hbm %s5339_s3, 6912 }
  0x5a   : > { %p3937_p8 = scmp.ne.s32.totalorder %s5339_s3, %s3936_s17  ;;  %p3943_p7 = scmp.lt.u32.totalorder %s3936_s17, %s5339_s3 }
  0x5c   : > { %p3939_p3 = pnand %p3938_p0, %p3937_p8 }
  0x5e   : > { %p3940_p5 = pneg %p3939_p3 }
  0x60   : > { %p3945_p11 = pnand %p3943_p7, %p3940_p5 }
  0x62   : > { %3948 = shalt.err (!%p3945_p11)
}
  0x63   : > { %s3949_s18 = scalar_lea.vmem %s225_s13, 6912  ;;  %p3957_p9 = scmp.lt.s32.totalorder %s225_s13, %s225_s13 }
  0x64   : > { %p3950_p1 = scmp.ne.s32.totalorder %s225_s13, %s3949_s18  ;;  %p3958_p6 = scmp.lt.s32.totalorder %s3949_s18, %s3949_s18 }
  0x66   : > { %p3952_p12 = pnand %p3950_p1, %p3938_p0  ;;  %p3959_p2 = por %p3958_p6, %p3957_p9 }
  0x68   : > { %p3953_p13 = pneg %p3952_p12 }
  0x6a   : > { %p3960_p4 = pnand %p3959_p2, %p3953_p13 }
  0x6c   : > { %3963 = shalt.err (!%p3960_p4)
}
  0x6d   : > { %s5340_s14 = smov 8   ;;  %s5341_s27 = smov 128  }
  0x6e   : > { %3769 = dma.hbm_to_vmem [thread:$0]  (!%p4412_p10), %s5339_s3, 6912, %s225_s13, [#allocation10], %s5341_s27, %s5341_s27, %s5340_s14  }
  0x6f   : > { %p5342_p6 = scmp.eq.s32.totalorder %s4314_s16, 0  ;;  %p53_p9 = scmp.ne.s32.totalorder %s4162_s26, %s4158_s25 }
  0x70   : > { %p59_p2 = scmp.ne.s32.totalorder %s4158_s25, %s4154_s24  ;;  %p205_p4 = scmp.eq.s32.totalorder %s2798_s21, 3 }
  0x71   : > { %s4440_s7 = scalar_select %p5342_p6, %s4162_s26, %s46_s12  }
  0x72   : > { %s241_s18 = sand.u32 1, %s4162_s26   ;;  %p5344_p8 = scmp.eq.s32.totalorder %s4182_s6, 0 }
  0x73   : > { %5343 = sst [smem:[#allocation31_spill]] %s4440_s7  ;;  %p5345_p3 = scmp.eq.s32.totalorder %s4389_s19, 0 }
  0x74   : > { %p55_p0 = por %p5344_p8, %p53_p9  ;;  %p5347_p7 = scmp.eq.s32.totalorder %s4389_s19, 3 }
  0x75   : > { %p4451_p5 = por %p5345_p3, %p59_p2  ;;  %p4461_p10 = por %p205_p4, %p59_p2 }
  0x76   : > { %p4457_p11 = por %p5347_p7, %p53_p9  ;;  %s2808_s13 = sshll.u32 %s241_s18, 7 }
  0x77   : > { %s5349_s16 = scalar_select %p4461_p10, 1, 0 }
  0x78   : > { %s5348_s17 = scalar_select %p4457_p11, 1, 0 }
  0x79   : > { %5350 = sst [smem:[#allocation32_spill]] %s5349_s16  ;;  %s2986_s12 = sshll.u32 %s4174_s29, 4 }
  0x7a   : > { %s252_s21 = sadd.s32 %s2986_s12, %s4337_s4  ;;  %s245_s20 = scalar_lea.vmem [#allocation3], %s2808_s13 }
  0x7b   : > { %s255_s9 = sshll.u32 %s245_s20, 4  ;;  %s2812_s15 = sshll.u32 %s252_s21, 7  ;;  %s4467_s9 = int_to_ptr.vmem [resolvable:$true] %s255_s9 }
  0x7c   : > { %s5351_s0 = sld [smem:[#allocation40_spill]]  ;;  %p5352_p1 = scmp.lt.s32.totalorder %s4182_s6, 4 }
  0x7d   : > { %s4480_s13 = scalar_lea.sflag [#allocation4], %s241_s18 }
  0x7e   : > { %p4476_p12 = pnand %p5352_p1, %p55_p0 }
  0x80   : > { %p3966_p6 = pneg %p4476_p12 }
  0x82   : > { %s4472_s30 = scalar_lea.hbm %s5351_s0, %s2812_s15  ;;  %s3969_s21 = scalar_lea.hbm %s5351_s0, 8192 }
  0x83   : > { %s3964_s12 = scalar_lea.hbm %s4472_s30, 2048  ;;  %p3970_p4 = scmp.lt.u32.totalorder %s4472_s30, %s5351_s0 }
  0x84   : > { %p3965_p13 = scmp.ne.s32.totalorder %s4472_s30, %s3964_s12  ;;  %p3971_p8 = scmp.lt.u32.totalorder %s3969_s21, %s3964_s12 }
  0x85   : > { %p3973_p3 = scmp.lt.u32.totalorder %s3964_s12, %s4472_s30 }
  0x86   : > { %p3967_p9 = pnand %p3966_p6, %p3965_p13  ;;  %p3972_p0 = por %p3971_p8, %p3970_p4 }
  0x88   : > { %p3968_p2 = pneg %p3967_p9  ;;  %p3974_p7 = por %p3973_p3, %p3972_p0 }
  0x8a   : > { %p3975_p1 = pnand %p3974_p7, %p3968_p2 }
  0x8c   : > { %3978 = shalt.err (!%p3975_p1)
}
  0x8d   : > { %s3979_s18 = scalar_lea.vmem %s4467_s9, 2048  ;;  %s4188_s1 = smov [#allocation3]  }
  0x8e   : > { %p3980_p13 = scmp.ne.s32.totalorder %s4467_s9, %s3979_s18  ;;  %s3984_s3 = sshll.u32 %s4188_s1, 4  ;;  %s3985_s3 = int_to_ptr.vmem [resolvable:$false] %s3984_s3 }
  0x8f   : > { %s3986_s20 = scalar_lea.vmem %s3985_s3, 4096  ;;  %p3987_p11 = scmp.lt.s32.totalorder %s4467_s9, %s3985_s3 }
  0x90   : > { %p3982_p9 = pnand %p3980_p13, %p3966_p6  ;;  %p3988_p4 = scmp.lt.s32.totalorder %s3986_s20, %s3979_s18 }
  0x92   : > { %p3983_p10 = pneg %p3982_p9  ;;  %p3989_p8 = por %p3988_p4, %p3987_p11 }
  0x94   : > { %p3990_p0 = pnand %p3989_p8, %p3983_p10 }
  0x96   : > { %3993 = shalt.err (!%p3990_p0)
}
  0x97   : > { %s5354_s12 = sld [smem:[#allocation19_spill]]  ;;  %s5355_s21 = sld [smem:[#allocation29_spill]] }
  0x98   : > { %s5356_s15 = sld [smem:[#allocation18_spill]]  ;;  %s5357_s1 = sld [smem:[#allocation17_spill]] }
  0x99   : > { %s5358_s18 = sld [smem:[#allocation28_spill]]  ;;  %p5360_p10 = scmp.lt.s32.totalorder %s4329_s11, 15 }
  0x9a   : > { %3773 = dma.hbm_to_vmem [thread:$0]  (!%p4476_p12), %s4472_s30, 2048, %s4467_s9, %s4480_s13, %s5341_s27, %s5341_s27, %s5340_s14  }
  0x9b   : > { %s5425_s11 = smov (!%p5360_p10, %s4329_s11), 15  ;;  %p5361_p3 = scmp.eq.s32.totalorder %s4182_s6, 0 }
  0x9c   : > { %p5362_p13 = scmp.eq.s32.totalorder %s4389_s19, 0  ;;  %s5364_s23 = sld [smem:[#allocation42_spill]] }
  0x9d   : > { %s118_s7 = sadd.s32 1, %s5354_s12  ;;  %p5359_p11 = scmp.lt.s32.totalorder %s5355_s21, 15 }
  0x9e   : > { %p125_p6 = scmp.ne.s32.totalorder %s5354_s12, %s5356_s15  ;;  %p131_p2 = scmp.ne.s32.totalorder %s5356_s15, %s5357_s1 }
  0x9f   : > { %s5423_s21 = smov (!%p5359_p11, %s5355_s21), 15  ;;  %s294_s20 = sand.u32 1, %s5354_s12  }
  0xa0   : > { %s114_s3 = ssub.s32 %s5423_s21, %s5425_s11  ;;  %p127_p7 = por %p125_p6, %p5361_p3 }
  0xa1   : > { %s115_s0 = sor.u32 %s114_s3, %s5358_s18  ;;  %p4528_p9 = por %p131_p2, %p5362_p13 }
  0xa2   : > { %p116_p1 = scmp.eq.s32.totalorder %s115_s0, 0  ;;  %s2819_s30 = sshll.u32 %s294_s20, 4 }
  0xa3   : > { %s5363_s29 = scalar_select %p4528_p9, 1, 0 }
  0xa4   : > { %s2821_s9 = sshll.u32 %s5423_s21, 1  ;;  %s5427_s12 = smov (!%p116_p1, %s5354_s12), %s118_s7 }
  0xa5   : > { %s306_s13 = sadd.s32 %s2821_s9, %s4337_s4  ;;  %s296_s28 = scalar_lea.vmem [#allocation8], %s2819_s30 }
  0xa6   : > { %s2823_s26 = sshll.u32 %s306_s13, 7  ;;  %s309_s15 = sshll.u32 %s296_s28, 4  ;;  %s4541_s15 = int_to_ptr.vmem [resolvable:$true] %s309_s15 }
  0xa7   : > { %s5365_s16 = smov %s5364_s23  ;;  %s4539_s18 = scalar_lea.hbm %s5364_s23, %s2823_s26 }
  0xa8   : > { %p5366_p12 = scmp.lt.s32.totalorder %s4182_s6, 4  ;;  %s3994_s4 = scalar_lea.hbm %s4539_s18, 256 }
  0xa9   : > { %p3995_p8 = scmp.ne.s32.totalorder %s4539_s18, %s3994_s4  ;;  %s3999_s28 = scalar_lea.hbm %s5365_s16, 8192 }
  0xaa   : > { %p4545_p4 = pnand %p5366_p12, %p127_p7  ;;  %p4000_p6 = scmp.lt.u32.totalorder %s4539_s18, %s5365_s16 }
  0xab   : > { %p4001_p2 = scmp.lt.u32.totalorder %s3999_s28, %s3994_s4  ;;  %p4003_p7 = scmp.lt.u32.totalorder %s3994_s4, %s4539_s18 }
  0xac   : > { %p3996_p0 = pneg %p4545_p4 }
  0xad   : > { %p4002_p3 = por %p4001_p2, %p4000_p6 }
  0xae   : > { %p3997_p11 = pnand %p3996_p0, %p3995_p8 }
  0xaf   : > { %p4004_p1 = por %p4003_p7, %p4002_p3 }
  0xb0   : > { %p3998_p10 = pneg %p3997_p11 }
  0xb2   : > { %p4005_p13 = pnand %p4004_p1, %p3998_p10 }
  0xb4   : > { %4008 = shalt.err (!%p4005_p13)
}
  0xb5   : > { %s4009_s3 = scalar_lea.vmem %s4541_s15, 256  ;;  %s4189_s20 = smov [#allocation8]  }
  0xb6   : > { %p4010_p12 = scmp.ne.s32.totalorder %s4541_s15, %s4009_s3  ;;  %s4014_s30 = sshll.u32 %s4189_s20, 4  ;;  %s4015_s30 = int_to_ptr.vmem [resolvable:$false] %s4014_s30 }
  0xb7   : > { %s4016_s9 = scalar_lea.vmem %s4015_s30, 512  ;;  %p4017_p9 = scmp.lt.s32.totalorder %s4541_s15, %s4015_s30 }
  0xb8   : > { %p4012_p8 = pnand %p4010_p12, %p3996_p0  ;;  %p4018_p6 = scmp.lt.s32.totalorder %s4016_s9, %s4009_s3 }
  0xba   : > { %p4013_p11 = pneg %p4012_p8  ;;  %p4019_p2 = por %p4018_p6, %p4017_p9 }
  0xbc   : > { %p4020_p3 = pnand %p4019_p2, %p4013_p11 }
  0xbe   : > { %4023 = shalt.err (!%p4020_p3)
}
  0xbf   : > { %3779 = dma.hbm_to_vmem [thread:$0]  (!%p4545_p4), %s4539_s18, 256, %s4541_s15, %s4357_s2, %s5341_s27, %s5341_s27, %s5340_s14  }
  0xc0   : > { %p5368_p0 = scmp.ne.s32.totalorder %s5337_s5, 0 }
  0xc2   : > { %321 = sbr.rel (%p5368_p0) target bundleno = 624 (0x270), region = 40 }
  0xc9   : > { %s4581_s13 = sand.u32 1, %s4158_s25  }
  0xca   : > { %s2825_s1 = sshll.u32 %s4581_s13, 7  ;;  %s324_s11 = scalar_lea.sflag [#allocation4], %s4581_s13 }
  0xcb   : > { %s4587_s0 = scalar_lea.vmem [#allocation3], %s2825_s1 }
  0xcc   : > { %4109 = dma.done.wait (%p4451_p5), %s324_s11, 2048  }
  0xcd   : > { %4111 = vsyncadd (%p4451_p5), %s324_s11, 4294965248  ;;  %s332_s2 = sand.u32 1, %s4389_s19   ;;  %s334_s5 = sand.u32 1, %s4146_s22  }
  0xce   : > { %s4595_s14 = sshll.u32 %s334_s5, 4  ;;  %s333_s27 = scalar_lea.sflag [#allocation7], %s332_s2 }
  0xcf   : > { %s336_s15 = scalar_lea.vmem [#allocation6], %s4595_s14  ;;  %p5369_p9 = scmp.ne.s32.totalorder %s5336_s8, 0 }
  0xd1   : > { %4113 = dma.done.wait (%p5369_p9), %s333_s27, 256  }
  0xd2   : > { %4115 = vsyncadd (%p5369_p9), %s333_s27, 4294967040  ;;  %s5370_s18 = sld [smem:[#allocation18_spill]]  ;;  %p5371_p5 = scmp.ne.s32.totalorder %s5363_s29, 0 }
  0xd8   : > { %s343_s4 = sand.u32 1, %s5370_s18  }
  0xd9   : > { %s4603_s10 = sshll.u32 %s343_s4, 4 }
  0xda   : > { %s345_s23 = scalar_lea.vmem [#allocation8], %s4603_s10 }
  0xdb   : > { %4117 = dma.done.wait (%p5371_p5), %s333_s27, 256  }
  0xdc   : > { %4119 = vsyncadd (%p5371_p5), %s333_s27, 4294967040  ;;  %p5372_p4 = scmp.eq.s32.totalorder %s4389_s19, 0 }
  0xde   : > { %4121 = dma.done.wait (%p5372_p4), [#allocation10], 6912   ;;  %p5373_p10 = pmov %p5372_p4 }
  0xdf   : > { %s5374_s8 = sld [smem:[#allocation22_spill]]  ;;  %vm428_vm0 = vcmask 385024   ;;  %v4190_v0 = vmov 0.0   ;;  %v624_v1 = vld [vmem:[#allocation9 + $0x30] sm:$0xff]  ;;  %v625_v2 = vld [vmem:[#allocation9 + $0x38] sm:$0xff]  ;;  %v1449_v3 = vld [vmem:[#allocation9 + $0xc0] sm:$0xff] }
  0xe0   : > { %4123 = vsyncadd (%p5373_p10), [#allocation10], 4294960384  ;;  %440 = vst.msk [vmem:[#allocation2 + $0x29] sm:$0x1] %vm428_vm0, %v4190_v0  ;;  %v3512_v4 = vpack.c.bf16 %v625_v2, %v624_v1  ;;  %v1450_v5 = vld [vmem:[#allocation9 + $0xc8] sm:$0xff]  ;;  %v626_v6 = vld [vmem:[#allocation9 + $0x40] sm:$0xff] }
  0xe1   : > { %429 = vst.msk [vmem:[#allocation2] sm:$0x1] %vm428_vm0, %v4190_v0  ;;  %430 = vst.msk [vmem:[#allocation2 + $0x18] sm:$0x1] %vm428_vm0, %v4190_v0  ;;  %v627_v7 = vld [vmem:[#allocation9 + $0x48] sm:$0xff]  ;;  %v4637_v8 = vpack.c.bf16 %v1450_v5, %v1449_v3  ;;  %v1451_v10 = vld [vmem:[#allocation9 + $0xd0] sm:$0xff] }
  0xe2   : > { %431 = vst.msk [vmem:[#allocation2 + $0x30] sm:$0x1] %vm428_vm0, %v4190_v0  ;;  %432 = vst.msk [vmem:[#allocation2 + $0x48] sm:$0x1] %vm428_vm0, %v4190_v0  ;;  %v3516_v9 = vpack.c.bf16 %v627_v7, %v626_v6  ;;  %v1452_v11 = vld [vmem:[#allocation9 + $0xd8] sm:$0xff]  ;;  %v628_v12 = vld [vmem:[#allocation9 + $0x50] sm:$0xff]  ;;  %3513 = vmatprep.subr.bf16.mxu1 %v3512_v4 }
  0xe3   : > { %433 = vst.msk [vmem:[#allocation2 + $0x60] sm:$0x1] %vm428_vm0, %v4190_v0  ;;  %434 = vst.msk [vmem:[#allocation2 + $0x78] sm:$0x1] %vm428_vm0, %v4190_v0  ;;  %vm449_vm1 = vcmask 392192   ;;  %v4639_v14 = vpack.c.bf16 %v1452_v11, %v1451_v10  ;;  %v629_v15 = vld [vmem:[#allocation9 + $0x58] sm:$0xff]  ;;  %3561 = vmatprep.subr.bf16.mxu0 %v4637_v8  ;;  %3515 = vmatpush3.bf16.msra.mxu1 %v3512_v4 }
  0xe4   : > { %435 = vst.msk [vmem:[#allocation2 + $0x90] sm:$0x1] %vm428_vm0, %v4190_v0  ;;  %436 = vst.msk [vmem:[#allocation2 + $0xa8] sm:$0x1] %vm428_vm0, %v4190_v0  ;;  %v1453_v16 = vld [vmem:[#allocation9 + $0xe0] sm:$0xff]  ;;  %v1454_v17 = vld [vmem:[#allocation9 + $0xe8] sm:$0xff]  ;;  %3563 = vmatpush3.bf16.msra.mxu0 %v4637_v8  ;;  %3517 = vmatprep.subr.bf16.mxu1 %v3516_v9  ;;  %v3520_v21 = vpack.c.bf16 %v629_v15, %v628_v12 }
  0xe5   : > { %p414_p7 = scmp.ne.s32.totalorder %s5374_s8, 0  ;;  %437 = vst.msk [vmem:[#allocation2 + $0xc0] sm:$0x1] %vm428_vm0, %v4190_v0  ;;  %438 = vst.msk [vmem:[#allocation2 + $0xd8] sm:$0x1] %vm428_vm0, %v4190_v0  ;;  %v412_v18 = vld [vmem:[%s336_s15] sm:$0xff]  ;;  %3565 = vmatprep.subr.bf16.mxu0 %v4639_v14  ;;  %v4656_v25 = vpack.c.bf16 %v1454_v17, %v1453_v16 }
  0xe6   : > { %439 = vst.msk [vmem:[#allocation2 + $0x11] sm:$0x1] %vm428_vm0, %v4190_v0  ;;  %441 = vst.msk [vmem:[#allocation2 + $0x41] sm:$0x1] %vm428_vm0, %v4190_v0  ;;  %v413_v19 = vld [vmem:[%s336_s15 + $0x8] sm:$0xff]  ;;  %v4647_v20 = vld [vmem:[%s4587_s0] sm:$0xff] }
  0xe7   : > { %442 = vst.msk [vmem:[#allocation2 + $0x59] sm:$0x1] %vm428_vm0, %v4190_v0  ;;  %443 = vst.msk [vmem:[#allocation2 + $0x71] sm:$0x1] %vm428_vm0, %v4190_v0  ;;  %s415_s29 = scalar_select %p414_p7, 1, 0  ;;  %3519 = vmatpush3.bf16.msra.mxu1 %v3516_v9 }
  0xe8   : > { %444 = vst.msk [vmem:[#allocation2 + $0x89] sm:$0x1] %vm428_vm0, %v4190_v0  ;;  %445 = vst.msk [vmem:[#allocation2 + $0xa1] sm:$0x1] %vm428_vm0, %v4190_v0  ;;  %v4653_v24 = vld [vmem:[%s4587_s0 + $0x8] sm:$0xff]  ;;  %v617_v26 = vld [vmem:[#allocation9] sm:$0xff]  ;;  %3567 = vmatpush3.bf16.msra.mxu0 %v4639_v14  ;;  %3521 = vmatprep.subr.bf16.mxu1 %v3520_v21 }
  0xe9   : > { %446 = vst.msk [vmem:[#allocation2 + $0xb9] sm:$0x1] %vm428_vm0, %v4190_v0  ;;  %447 = vst.msk [vmem:[#allocation2 + $0xd1] sm:$0x1] %vm428_vm0, %v4190_v0  ;;  %s416_s19 = scvt.s32.f32 %s415_s29  ;;  %v618_v27 = vld [vmem:[#allocation9 + $0x8] sm:$0xff]  ;;  %v4661_v28 = vld [vmem:[%s4587_s0 + $0x10] sm:$0xff]  ;;  %3569 = vmatprep.subr.bf16.mxu0 %v4656_v25 }
  0xea   : > { %448 = vst.msk [vmem:[#allocation2 + $0xe9] sm:$0x1] %vm428_vm0, %v4190_v0  ;;  %v1665_v29 = vld [vmem:[#allocation9 + $0xf0] sm:$0xff]  ;;  %v1666_v30 = vld [vmem:[#allocation9 + $0xf8] sm:$0xff]  ;;  %v4673_v32 = vld [vmem:[%s4587_s0 + $0x20] sm:$0xff]  ;;  %v3524_v35 = vpack.c.bf16 %v618_v27, %v617_v26  ;;  %p422_p1 = scmp.ne.s32.totalorder %s5374_s8, 1 }
  0xeb   : > { %v417_v13 = vstv %s416_s19  ;;  %453 = vst.msk [vmem:[#allocation2 + $0x19] sm:$0xff] %vm449_vm1, %v4647_v20  ;;  %454 = vst.msk [vmem:[#allocation2 + $0x21] sm:$0xff] %vm449_vm1, %v4653_v24  ;;  %v4668_v31 = vld [vmem:[%s4587_s0 + $0x18] sm:$0xff]  ;;  %v4676_v33 = vld [vmem:[%s4587_s0 + $0x28] sm:$0xff]  ;;  %v3572_v36 = vpack.c.bf16 %v1666_v30, %v1665_v29  ;;  %3523 = vmatpush3.bf16.msra.mxu1 %v3520_v21  ;;  %s5382_s3 = sld [smem:[#allocation44_spill]]  ;;  %s5129_s20 = scalar_lea.vmem [#allocation11], %s2825_s1 }
  0xec   : > { %v418_v22 = vmul.f32 %v417_v13, %v412_v18  ;;  %v419_v23 = vmul.f32 %v417_v13, %v413_v19  ;;  %455 = vst.msk [vmem:[#allocation2 + $0x31] sm:$0xff] %vm449_vm1, %v4661_v28  ;;  %456 = vst.msk [vmem:[#allocation2 + $0x39] sm:$0xff] %vm449_vm1, %v4668_v31  ;;  %v4684_v34 = vld [vmem:[%s4587_s0 + $0x30] sm:$0xff]  ;;  %v1667_v37 = vld [vmem:[#allocation9 + $0x100] sm:$0xff]  ;;  %3571 = vmatpush3.bf16.msra.mxu0 %v4656_v25  ;;  %3525 = vmatprep.subr.bf16.mxu1 %v3524_v35  ;;  %s4769_s26 = scalar_select %p422_p1, 1, 0 }
  0xed   : > { %457 = vst.msk [vmem:[#allocation2 + $0x49] sm:$0xff] %vm449_vm1, %v4673_v32  ;;  %458 = vst.msk [vmem:[#allocation2 + $0x51] sm:$0xff] %vm449_vm1, %v4676_v33  ;;  %v4690_v38 = vld [vmem:[%s4587_s0 + $0x38] sm:$0xff]  ;;  %v1668_v39 = vld [vmem:[#allocation9 + $0x108] sm:$0xff]  ;;  %3573 = vmatprep.subr.bf16.mxu0 %v3572_v36  ;;  %s5384_s30 = sld [smem:[#allocation23_spill]]  ;;  %s2989_s9 = sshll.u32 %s5374_s8, 4 }
  0xee   : > { %450 = vst.msk [vmem:[#allocation2 + $0x1] sm:$0xff] %vm449_vm1, %v418_v22  ;;  %451 = vst.msk [vmem:[#allocation2 + $0x9] sm:$0xff] %vm449_vm1, %v419_v23  ;;  %v4695_v40 = vld [vmem:[%s4587_s0 + $0x40] sm:$0xff]  ;;  %v4698_v41 = vld [vmem:[%s4587_s0 + $0x48] sm:$0xff]  ;;  %v3576_v49 = vpack.c.bf16 %v1668_v39, %v1667_v37  ;;  %s424_s28 = scvt.s32.f32 %s4769_s26  ;;  %s2648_s2 = sshll.u32 %s5129_s20, 4  ;;  %s5192_s2 = int_to_ptr.vmem [resolvable:$true] %s2648_s2 }
  0xef   : > { %459 = vst.msk [vmem:[#allocation2 + $0x61] sm:$0xff] %vm449_vm1, %v4684_v34  ;;  %460 = vst.msk [vmem:[#allocation2 + $0x69] sm:$0xff] %vm449_vm1, %v4690_v38  ;;  %v619_v43 = vld [vmem:[#allocation9 + $0x10] sm:$0xff]  ;;  %v620_v44 = vld [vmem:[#allocation9 + $0x18] sm:$0xff]  ;;  %s5391_s27 = sld [smem:[#allocation45_spill]]  ;;  %s2632_s4 = scalar_lea.sflag [#allocation5], %s4581_s13 }
  0xf0   : > { %5375 = vst [vmem:[#allocation33_spill] sm:$0xff] %v4695_v40  ;;  %461 = vst.msk [vmem:[#allocation2 + $0x79] sm:$0xff] %vm449_vm1, %v4695_v40  ;;  %v3528_v50 = vpack.c.bf16 %v620_v44, %v619_v43  ;;  %v1669_v51 = vld [vmem:[#allocation9 + $0x110] sm:$0xff]  ;;  %v1670_v52 = vld [vmem:[#allocation9 + $0x118] sm:$0xff]  ;;  %s4024_s10 = scalar_lea.vmem %s5192_s2, 2048  ;;  %p5393_p12 = scmp.ne.s32.totalorder %s5348_s17, 0 }
  0xf1   : > { %462 = vst.msk [vmem:[#allocation2 + $0x81] sm:$0xff] %vm449_vm1, %v4698_v41  ;;  %v621_v53 = vld [vmem:[#allocation9 + $0x20] sm:$0xff]  ;;  %v622_v54 = vld [vmem:[#allocation9 + $0x28] sm:$0xff]  ;;  %v4712_v55 = vld [vmem:[%s4587_s0 + $0x50] sm:$0xff]  ;;  %v3580_v60 = vpack.c.bf16 %v1670_v52, %v1669_v51  ;;  %p4025_p13 = scmp.ne.s32.totalorder %s5192_s2, %s4024_s10 }
  0xf2   : > { %v536_v42 = vld [vmem:[#allocation2 + $0x19] sm:$0xff]  ;;  %v537_v45 = vld [vmem:[#allocation2 + $0x21] sm:$0xff]  ;;  %5376 = vst [vmem:[#allocation34_spill] sm:$0xff] %v4712_v55  ;;  %463 = vst.msk [vmem:[#allocation2 + $0x91] sm:$0xff] %vm449_vm1, %v4712_v55  ;;  %v3532_v61 = vpack.c.bf16 %v622_v54, %v621_v53 }
  0xf3   : > { %3344 = vmatprep.mubr.msk.f32.mxu0 %vm449_vm1, %v536_v42  ;;  %v4707_v48 = vld [vmem:[#allocation2 + $0x31] sm:$0xff]  ;;  %v4714_v56 = vld [vmem:[#allocation2 + $0x39] sm:$0xff]  ;;  %v4719_v57 = vld [vmem:[%s4587_s0 + $0x58] sm:$0xff]  ;;  %s2978_s1 = sshll.u32 %s5384_s30, 5  ;;  %p4026_p8 = pnand %p4025_p13, %p5393_p12 }
  0xf4   : > { %3345 = vmatmul.mubr.msk.f32.vlgmr.msra.gmra.mrb[0].mxu0 %vm449_vm1, %v537_v45  ;;  %5377 = vst [vmem:[#allocation35_spill] sm:$0xff] %v4719_v57  ;;  %v4724_v58 = vld [vmem:[#allocation2 + $0x49] sm:$0xff]  ;;  %464 = vst.msk [vmem:[#allocation2 + $0x99] sm:$0xff] %vm449_vm1, %v4719_v57  ;;  %v1882_v63 = vld [vmem:[#allocation9 + $0x128] sm:$0xff]  ;;  %s2645_s11 = sadd.s32 %s2989_s9, %s2978_s1 }
  0xf5   : > { %v488_v46 = vld [vmem:[#allocation2 + $0x1] sm:$0xff]  ;;  %v489_v47 = vld [vmem:[#allocation2 + $0x9] sm:$0xff]  ;;  %3575 = vmatpush3.bf16.msra.mxu0 %v3572_v36  ;;  %3347 = vmatprep.mubr.msk.f32.mxu0 %vm449_vm1, %v4707_v48  ;;  %v4737_v0 = vld [vmem:[%s4587_s0 + $0x68] sm:$0xff]  ;;  %v425_v36 = vstv %s424_s28  ;;  %s5392_s15 = smov %s5391_s27  ;;  %p4027_p11 = pneg %p4026_p8 }
  0xf6   : > { %3200 = vmatprep.mubr.msk.f32.mxu1 %vm449_vm1, %v488_v46  ;;  %v4729_v59 = vld [vmem:[%s4587_s0 + $0x60] sm:$0xff]  ;;  %3577 = vmatprep.subr.bf16.mxu0 %v3576_v49  ;;  %5379 = vst [vmem:[#allocation37_spill] sm:$0xff] %v4737_v0  ;;  %466 = vst.msk [vmem:[#allocation2 + $0xb1] sm:$0xff] %vm449_vm1, %v4737_v0  ;;  %v4747_v2 = vld [vmem:[#allocation2 + $0x61] sm:$0xff] }
  0xf7   : > { %3201 = vmatmul.mubr.msk.f32.vlgmr.msra.gmra.mrb[0].mxu1 %vm449_vm1, %v489_v47  ;;  %5378 = vst [vmem:[#allocation36_spill] sm:$0xff] %v4729_v59  ;;  %465 = vst.msk [vmem:[#allocation2 + $0xa9] sm:$0xff] %vm449_vm1, %v4729_v59  ;;  %v1881_v62 = vld [vmem:[#allocation9 + $0x120] sm:$0xff]  ;;  %v1018_v4 = vld [vmem:[#allocation9 + $0x68] sm:$0xff] }
  0xf8   : > { %3527 = vmatpush3.bf16.msra.mxu1 %v3524_v35  ;;  %3203 = vmatprep.mubr.msk.f32.mxu1 %vm449_vm1, %v536_v42  ;;  %v4743_v1 = vld [vmem:[#allocation2 + $0x51] sm:$0xff]  ;;  %v3584_v5 = vpack.c.bf16 %v1882_v63, %v1881_v62  ;;  %v4760_v7 = vld [vmem:[#allocation2 + $0x69] sm:$0xff]  ;;  %v4762_v9 = vld [vmem:[#allocation2 + $0x1a] sm:$0xff] }
  0xf9   : > { %3529 = vmatprep.subr.bf16.mxu1 %v3528_v50  ;;  %3348 = vmatmul.mubr.msk.f32.gmra.mrb[2].mxu0 %vm449_vm1, %v4714_v56  ;;  %v1017_v3 = vld [vmem:[#allocation9 + $0x60] sm:$0xff]  ;;  %v1883_v10 = vld [vmem:[#allocation9 + $0x130] sm:$0xff]  ;;  %v1884_v11 = vld [vmem:[#allocation9 + $0x138] sm:$0xff] }
  0xfa   : > { %3350 = vmatprep.mubr.msk.f32.mxu0 %vm449_vm1, %v4724_v58  ;;  %3579 = vmatpush3.bf16.msra.mxu0 %v3576_v49  ;;  %v4749_v6 = vpack.c.bf16 %v1018_v4, %v1017_v3  ;;  %v4775_v12 = vld [vmem:[#allocation2 + $0x22] sm:$0xff]  ;;  %v4783_v16 = vld [vmem:[#allocation2 + $0x79] sm:$0xff]  ;;  %v3588_v17 = vpack.c.bf16 %v1884_v11, %v1883_v10  ;;  %v1885_v19 = vld [vmem:[#allocation9 + $0x140] sm:$0xff] }
  0xfb   : > { %3204 = vmatmul.mubr.msk.f32.gmra.mrb[2].mxu1 %vm449_vm1, %v537_v45  ;;  %3581 = vmatprep.subr.bf16.mxu0 %v3580_v60  ;;  %v4778_v13 = vld [vmem:[%s4587_s0 + $0x70] sm:$0xff]  ;;  %v4781_v15 = vld [vmem:[%s4587_s0 + $0x78] sm:$0xff]  ;;  %v4789_v18 = vld [vmem:[#allocation2 + $0x32] sm:$0xff]  ;;  %s2979_s0 = sshll.u32 %s2645_s11, 7 }
  0xfc   : > { %3206 = vmatprep.mubr.msk.f32.mxu1 %vm449_vm1, %v4707_v48  ;;  %3531 = vmatpush3.bf16.msra.mxu1 %v3528_v50  ;;  %5380 = vst [vmem:[#allocation38_spill] sm:$0xff] %v4778_v13  ;;  %5381 = vst [vmem:[#allocation39_spill] sm:$0xff] %v4781_v15  ;;  %v1886_v21 = vld [vmem:[#allocation9 + $0x148] sm:$0xff]  ;;  %v4798_v22 = vld [vmem:[#allocation2 + $0x81] sm:$0xff]  ;;  %s5190_s18 = scalar_lea.hbm %s5391_s27, %s2979_s0 }
  0xfd   : > { %3533 = vmatprep.subr.bf16.mxu1 %v3532_v61  ;;  %3351 = vmatmul.mubr.msk.f32.gmra.mrb[4].mxu0 %vm449_vm1, %v4743_v1  ;;  %467 = vst.msk [vmem:[#allocation2 + $0xc1] sm:$0xff] %vm449_vm1, %v4778_v13  ;;  %468 = vst.msk [vmem:[#allocation2 + $0xc9] sm:$0xff] %vm449_vm1, %v4781_v15  ;;  %v4800_v23 = vld [vmem:[#allocation2 + $0x3a] sm:$0xff]  ;;  %v4804_v26 = vld [vmem:[#allocation2 + $0x91] sm:$0xff]  ;;  %v3592_v29 = vpack.c.bf16 %v1886_v21, %v1885_v19 }
  0xfe   : > { %3353 = vmatprep.mubr.msk.f32.mxu0 %vm449_vm1, %v4747_v2  ;;  %3583 = vmatpush3.bf16.msra.mxu0 %v3580_v60  ;;  %v4806_v27 = vld [vmem:[#allocation2 + $0x4a] sm:$0xff]  ;;  %v2097_v30 = vld [vmem:[#allocation9 + $0x150] sm:$0xff]  ;;  %v4818_v39 = vld [vmem:[#allocation2 + $0x52] sm:$0xff] }
  0xff   : > { %3207 = vmatmul.mubr.msk.f32.gmra.mrb[4].mxu1 %vm449_vm1, %v4714_v56  ;;  %3585 = vmatprep.subr.bf16.mxu0 %v3584_v5  ;;  %v2098_v35 = vld [vmem:[#allocation9 + $0x158] sm:$0xff]  ;;  %v4816_v37 = vld [vmem:[#allocation2 + $0x99] sm:$0xff]  ;;  %v4838_v50 = vld [vmem:[#allocation2 + $0xb1] sm:$0xff] }
 0x100   : > { %3209 = vmatprep.mubr.msk.f32.mxu1 %vm449_vm1, %v4724_v58  ;;  %3535 = vmatpush3.bf16.msra.mxu1 %v3532_v61  ;;  %v4820_v42 = vld [vmem:[#allocation2 + $0xa9] sm:$0xff]  ;;  %v4826_v45 = vpack.c.bf16 %v2098_v35, %v2097_v30  ;;  %v472_v52 = vld [vmem:[#allocation2] sm:$0xff]  ;;  %v4856_v63 = vld [vmem:[#allocation2 + $0x18] sm:$0xff] }
 0x101   : > { %3537 = vmatprep.subr.bf16.mxu1 %v4749_v6  ;;  %3354 = vmatmul.mubr.msk.f32.gmra.mrb[6].mxu0 %vm449_vm1, %v4760_v7  ;;  %v4822_v43 = vld [vmem:[#allocation2 + $0x62] sm:$0xff]  ;;  %v4840_v51 = vld [vmem:[#allocation2 + $0x6a] sm:$0xff]  ;;  %v4843_v53 = vld [vmem:[#allocation2 + $0x7a] sm:$0xff] }
 0x102   : > { %3380 = vmatprep.mubr.msk.f32.mxu0 %vm449_vm1, %v4762_v9  ;;  %v420_v44 = vld [vmem:[%s345_s23] sm:$0xff]  ;;  %v421_v47 = vld [vmem:[%s345_s23 + $0x8] sm:$0xff]  ;;  %s4191_s23 = smov [#allocation11]  }
 0x103   : > { %3210 = vmatmul.mubr.msk.f32.gmra.mrb[6].mxu1 %vm449_vm1, %v4743_v1  ;;  %v426_v46 = vmul.f32 %v425_v36, %v420_v44  ;;  %v427_v49 = vmul.f32 %v425_v36, %v421_v47  ;;  %v1019_v54 = vld [vmem:[#allocation9 + $0x70] sm:$0xff]  ;;  %v1020_v60 = vld [vmem:[#allocation9 + $0x78] sm:$0xff]  ;;  %v4858_v4 = vld [vmem:[#allocation2 + $0x92] sm:$0xff]  ;;  %s4028_s8 = sshll.u32 %s4191_s23, 4  ;;  %s4029_s8 = int_to_ptr.vmem [resolvable:$false] %s4028_s8 }
 0x104   : > { %3212 = vmatprep.mubr.msk.f32.mxu1 %vm449_vm1, %v4747_v2  ;;  %v473_v61 = vld [vmem:[#allocation2 + $0x8] sm:$0xff]  ;;  %v3540_v3 = vpack.c.bf16 %v1020_v60, %v1019_v54  ;;  %v1022_v10 = vld [vmem:[#allocation9 + $0x88] sm:$0xff]  ;;  %v4866_v11 = vld [vmem:[#allocation2 + $0x20] sm:$0xff]  ;;  %s4030_s29 = scalar_lea.vmem %s4029_s8, 4096  ;;  %p4031_p6 = scmp.lt.s32.totalorder %s5192_s2, %s4029_s8 }
 0x105   : > { %3381 = vmatmul.mubr.msk.f32.vlgmr.msra.gmra.mrb[0].mxu0 %vm449_vm1, %v4775_v12  ;;  %470 = vst.msk [vmem:[#allocation2 + $0xd9] sm:$0xff] %vm449_vm1, %v426_v46  ;;  %471 = vst.msk [vmem:[#allocation2 + $0xe1] sm:$0xff] %vm449_vm1, %v427_v49  ;;  %v4854_v62 = vld [vmem:[#allocation2 + $0x82] sm:$0xff]  ;;  %v4872_v19 = vld [vmem:[#allocation2 + $0x30] sm:$0xff]  ;;  %p4032_p2 = scmp.lt.s32.totalorder %s4030_s29, %s4024_s10 }
 0x106   : > { %3587 = vmatpush3.bf16.msra.mxu0 %v3584_v5  ;;  %3383 = vmatprep.mubr.msk.f32.mxu0 %vm449_vm1, %v4789_v18  ;;  %v1021_v5 = vld [vmem:[#allocation9 + $0x80] sm:$0xff]  ;;  %v1234_v30 = vld [vmem:[#allocation9 + $0x98] sm:$0xff]  ;;  %v4884_v35 = vld [vmem:[#allocation2 + $0x38] sm:$0xff] }
 0x107   : > { %3213 = vmatmul.mubr.msk.f32.gmra.mrb[8].mxu1 %vm449_vm1, %v4760_v7  ;;  %3589 = vmatprep.subr.bf16.mxu0 %v3588_v17  ;;  %v4874_v21 = vld [vmem:[#allocation2 + $0xaa] sm:$0xff]  ;;  %v4886_v36 = vld [vmem:[#allocation2 + $0xb2] sm:$0xff]  ;;  %v4890_v46 = vld [vmem:[#allocation2 + $0xc2] sm:$0xff]  ;;  %p4033_p3 = por %p4032_p2, %p4031_p6 }
 0x108   : > { %3215 = vmatprep.mubr.msk.f32.mxu1 %vm449_vm1, %v4783_v16  ;;  %v4888_v44 = vld [vmem:[#allocation2 + $0x48] sm:$0xff]  ;;  %v4900_v49 = vld [vmem:[#allocation2 + $0x50] sm:$0xff]  ;;  %v4904_v54 = vld [vmem:[#allocation2 + $0x60] sm:$0xff] }
 0x109   : > { %3384 = vmatmul.mubr.msk.f32.gmra.mrb[2].mxu0 %vm449_vm1, %v4800_v23  ;;  %v2099_v60 = vld [vmem:[#allocation9 + $0x160] sm:$0xff]  ;;  %v4939_v15 = vld [vmem:[#allocation2 + $0x98] sm:$0xff]  ;;  %v4941_v59 = vld [vmem:[#allocation2 + $0xa8] sm:$0xff]  ;;  %p4034_p0 = pnand %p4033_p3, %p4027_p11 }
 0x10a   : > { %3386 = vmatprep.mubr.msk.f32.mxu0 %vm449_vm1, %v4806_v27  ;;  %3591 = vmatpush3.bf16.msra.mxu0 %v3588_v17  ;;  %v4868_v17 = vld [vmem:[#allocation2 + $0x9a] sm:$0xff]  ;;  %v4929_v13 = vld [vmem:[#allocation2 + $0x90] sm:$0xff]  ;;  %v504_v0 = vld [vmem:[#allocation2 + $0x2] sm:$0xff] }
 0x10b   : > { %3216 = vmatmul.mubr.msk.f32.gmra.mrb[10].mxu1 %vm449_vm1, %v4798_v22  ;;  %3593 = vmatprep.subr.bf16.mxu0 %v3592_v29  ;;  %v1235_v55 = vld [vmem:[#allocation9 + $0xa0] sm:$0xff]  ;;  %v1238_v57 = vld [vmem:[#allocation9 + $0xb8] sm:$0xff] }
 0x10c   : > { %3218 = vmatprep.mubr.msk.f32.mxu1 %vm449_vm1, %v4804_v26 }
 0x10d   : > { %3387 = vmatmul.mubr.msk.f32.gmra.mrb[4].mxu0 %vm449_vm1, %v4818_v39 }
 0x10e   : > { %3389 = vmatprep.mubr.msk.f32.mxu0 %vm449_vm1, %v4822_v43  ;;  %3595 = vmatpush3.bf16.msra.mxu0 %v3592_v29  ;;  %v3544_v29 = vpack.c.bf16 %v1022_v10, %v1021_v5  ;;  %v4916_v5 = vld [vmem:[#allocation2 + $0x78] sm:$0xff] }
 0x10f   : > { %3219 = vmatmul.mubr.msk.f32.gmra.mrb[12].mxu1 %vm449_vm1, %v4816_v37  ;;  %3597 = vmatprep.subr.bf16.mxu0 %v4826_v45 }
 0x110   : > { %3221 = vmatprep.mubr.msk.f32.mxu1 %vm449_vm1, %v4820_v42 }
 0x111   : > { %3390 = vmatmul.mubr.msk.f32.gmra.mrb[6].mxu0 %vm449_vm1, %v4840_v51 }
 0x112   : > { %3392 = vmatprep.mubr.msk.f32.mxu0 %vm449_vm1, %v4843_v53 }
 0x113   : > { %3222 = vmatmul.mubr.msk.f32.gmra.mrb[14].mxu1 %vm449_vm1, %v4838_v50 }
 0x114   : > { %3236 = vmatprep.mubr.msk.f32.mxu1 %vm449_vm1, %v472_v52  ;;  %v4902_v52 = vld [vmem:[#allocation2 + $0xca] sm:$0xff] }
 0x115   : > { %3393 = vmatmul.mubr.msk.f32.gmra.mrb[8].mxu0 %vm449_vm1, %v4854_v62 }
 0x116   : > { %3395 = vmatprep.mubr.msk.f32.mxu0 %vm449_vm1, %v4858_v4 }
 0x117   : > { %3237 = vmatmul.mubr.msk.f32.vlgmr.msra.gmra.mrb[0].mxu1 %vm449_vm1, %v473_v61  ;;  %v2100_v61 = vld [vmem:[#allocation9 + $0x168] sm:$0xff] }
 0x118   : > { %3539 = vmatpush3.bf16.msra.mxu1 %v4749_v6  ;;  %3239 = vmatprep.mubr.msk.f32.mxu1 %vm449_vm1, %v4856_v63  ;;  %v1233_v6 = vld [vmem:[#allocation9 + $0x90] sm:$0xff]  ;;  %v3600_v10 = vpack.c.bf16 %v2100_v61, %v2099_v60  ;;  %v2313_v61 = vld [vmem:[#allocation9 + $0x180] sm:$0xff] }
 0x119   : > { %3541 = vmatprep.subr.bf16.mxu1 %v3540_v3  ;;  %3396 = vmatmul.mubr.msk.f32.gmra.mrb[10].mxu0 %vm449_vm1, %v4868_v17  ;;  %v3548_v47 = vpack.c.bf16 %v1234_v30, %v1233_v6  ;;  %v2102_v6 = vld [vmem:[#allocation9 + $0x178] sm:$0xff]  ;;  %v4925_v30 = vld [vmem:[#allocation2 + $0x80] sm:$0xff] }
 0x11a   : > { %3398 = vmatprep.mubr.msk.f32.mxu0 %vm449_vm1, %v4874_v21 }
 0x11b   : > { %3240 = vmatmul.mubr.msk.f32.gmra.mrb[2].mxu1 %vm449_vm1, %v4866_v11 }
 0x11c   : > { %3242 = vmatprep.mubr.msk.f32.mxu1 %vm449_vm1, %v4872_v19  ;;  %3543 = vmatpush3.bf16.msra.mxu1 %v3540_v3  ;;  %v4914_v3 = vld [vmem:[#allocation2 + $0x68] sm:$0xff] }
 0x11d   : > { %3545 = vmatprep.subr.bf16.mxu1 %v3544_v29  ;;  %3399 = vmatmul.mubr.msk.f32.gmra.mrb[12].mxu0 %vm449_vm1, %v4886_v36 }
 0x11e   : > { %3401 = vmatprep.mubr.msk.f32.mxu0 %vm449_vm1, %v4890_v46 }
 0x11f   : > { %3243 = vmatmul.mubr.msk.f32.gmra.mrb[4].mxu1 %vm449_vm1, %v4884_v35 }
 0x120   : > { %3245 = vmatprep.mubr.msk.f32.mxu1 %vm449_vm1, %v4888_v44  ;;  %3547 = vmatpush3.bf16.msra.mxu1 %v3544_v29  ;;  %v2101_v29 = vld [vmem:[#allocation9 + $0x170] sm:$0xff] }
 0x121   : > { %3549 = vmatprep.subr.bf16.mxu1 %v3548_v47  ;;  %3402 = vmatmul.mubr.msk.f32.gmra.mrb[14].mxu0 %vm449_vm1, %v4902_v52  ;;  %v3604_v60 = vpack.c.bf16 %v2102_v6, %v2101_v29  ;;  %v4951_v6 = vld [vmem:[#allocation2 + $0xb0] sm:$0xff] }
 0x122   : > { %3416 = vmatprep.mubr.msk.f32.mxu0 %vm449_vm1, %v4872_v19 }
 0x123   : > { %3246 = vmatmul.mubr.msk.f32.gmra.mrb[6].mxu1 %vm449_vm1, %v4900_v49 }
 0x124   : > { %3248 = vmatprep.mubr.msk.f32.mxu1 %vm449_vm1, %v4904_v54 }
 0x125   : > { %3417 = vmatmul.mubr.msk.f32.vlgmr.msra.gmra.mrb[0].mxu0 %vm449_vm1, %v4884_v35 }
 0x126   : > { %3599 = vmatpush3.bf16.msra.mxu0 %v4826_v45  ;;  %3419 = vmatprep.mubr.msk.f32.mxu0 %vm449_vm1, %v4888_v44  ;;  %v2314_v45 = vld [vmem:[#allocation9 + $0x188] sm:$0xff] }
 0x127   : > { %3249 = vmatmul.mubr.msk.f32.gmra.mrb[8].mxu1 %vm449_vm1, %v4914_v3  ;;  %3601 = vmatprep.subr.bf16.mxu0 %v3600_v10  ;;  %v3608_v29 = vpack.c.bf16 %v2314_v45, %v2313_v61  ;;  %v505_v61 = vld [vmem:[#allocation2 + $0xa] sm:$0xff] }
 0x128   : > { %3251 = vmatprep.mubr.msk.f32.mxu1 %vm449_vm1, %v4916_v5 }
 0x129   : > { %3420 = vmatmul.mubr.msk.f32.gmra.mrb[2].mxu0 %vm449_vm1, %v4900_v49 }
 0x12a   : > { %3422 = vmatprep.mubr.msk.f32.mxu0 %vm449_vm1, %v4904_v54  ;;  %3603 = vmatpush3.bf16.msra.mxu0 %v3600_v10  ;;  %v1236_v10 = vld [vmem:[#allocation9 + $0xa8] sm:$0xff] }
 0x12b   : > { %3252 = vmatmul.mubr.msk.f32.gmra.mrb[10].mxu1 %vm449_vm1, %v4925_v30  ;;  %3605 = vmatprep.subr.bf16.mxu0 %v3604_v60  ;;  %v3552_v45 = vpack.c.bf16 %v1236_v10, %v1235_v55  ;;  %v4977_v55 = vld [vmem:[#allocation2 + $0xc8] sm:$0xff] }
 0x12c   : > { %3254 = vmatprep.mubr.msk.f32.mxu1 %vm449_vm1, %v4929_v13 }
 0x12d   : > { %3423 = vmatmul.mubr.msk.f32.gmra.mrb[4].mxu0 %vm449_vm1, %v4914_v3 }
 0x12e   : > { %3425 = vmatprep.mubr.msk.f32.mxu0 %vm449_vm1, %v4916_v5  ;;  %3607 = vmatpush3.bf16.msra.mxu0 %v3604_v60  ;;  %v1237_v60 = vld [vmem:[#allocation9 + $0xb0] sm:$0xff] }
 0x12f   : > { %3255 = vmatmul.mubr.msk.f32.gmra.mrb[12].mxu1 %vm449_vm1, %v4939_v15  ;;  %3609 = vmatprep.subr.bf16.mxu0 %v3608_v29  ;;  %v3556_v40 = vpack.c.bf16 %v1238_v57, %v1237_v60  ;;  %v584_v57 = vld [vmem:[#allocation2 + $0xe0] sm:$0xff] }
 0x130   : > { %3257 = vmatprep.mubr.msk.f32.mxu1 %vm449_vm1, %v4941_v59 }
 0x131   : > { %3426 = vmatmul.mubr.msk.f32.gmra.mrb[6].mxu0 %vm449_vm1, %v4925_v30 }
 0x132   : > { %3428 = vmatprep.mubr.msk.f32.mxu0 %vm449_vm1, %v4929_v13 }
 0x133   : > { %3258 = vmatmul.mubr.msk.f32.gmra.mrb[14].mxu1 %vm449_vm1, %v4951_v6 }
 0x134   : > { %3272 = vmatprep.mubr.msk.f32.mxu1 %vm449_vm1, %v504_v0  ;;  %v4967_v0 = vld [vmem:[#allocation2 + $0xc0] sm:$0xff] }
 0x135   : > { %3429 = vmatmul.mubr.msk.f32.gmra.mrb[8].mxu0 %vm449_vm1, %v4939_v15 }
 0x136   : > { %3431 = vmatprep.mubr.msk.f32.mxu0 %vm449_vm1, %v4941_v59 }
 0x137   : > { %3273 = vmatmul.mubr.msk.f32.vlgmr.msra.gmra.mrb[0].mxu1 %vm449_vm1, %v505_v61  ;;  %v2318_v61 = vld [vmem:[#allocation9 + $0x1a8] sm:$0xff] }
 0x138   : > { %3551 = vmatpush3.bf16.msra.mxu1 %v3548_v47  ;;  %3275 = vmatprep.mubr.msk.f32.mxu1 %vm449_vm1, %v4762_v9  ;;  %v583_v9 = vld [vmem:[#allocation2 + $0xd8] sm:$0xff]  ;;  %v2316_v47 = vld [vmem:[#allocation9 + $0x198] sm:$0xff] }
 0x139   : > { %3553 = vmatprep.subr.bf16.mxu1 %v3552_v45  ;;  %3432 = vmatmul.mubr.msk.f32.gmra.mrb[10].mxu0 %vm449_vm1, %v4951_v6 }
 0x13a   : > { %3434 = vmatprep.mubr.msk.f32.mxu0 %vm449_vm1, %v4967_v0 }
 0x13b   : > { %3276 = vmatmul.mubr.msk.f32.gmra.mrb[2].mxu1 %vm449_vm1, %v4775_v12  ;;  %v2315_v12 = vld [vmem:[#allocation9 + $0x190] sm:$0xff] }
 0x13c   : > { %3278 = vmatprep.mubr.msk.f32.mxu1 %vm449_vm1, %v4789_v18  ;;  %3555 = vmatpush3.bf16.msra.mxu1 %v3552_v45  ;;  %v3612_v10 = vpack.c.bf16 %v2316_v47, %v2315_v12 }
 0x13d   : > { %3557 = vmatprep.subr.bf16.mxu1 %v3556_v40  ;;  %3435 = vmatmul.mubr.msk.f32.gmra.mrb[12].mxu0 %vm449_vm1, %v4977_v55 }
 0x13e   : > { %3437 = vmatprep.mubr.msk.f32.mxu0 %vm449_vm1, %v583_v9 }
 0x13f   : > { %3279 = vmatmul.mubr.msk.f32.gmra.mrb[4].mxu1 %vm449_vm1, %v4800_v23 }
 0x140   : > { %3281 = vmatprep.mubr.msk.f32.mxu1 %vm449_vm1, %v4806_v27  ;;  %3559 = vmatpush3.bf16.msra.mxu1 %v3556_v40  ;;  %v2317_v40 = vld [vmem:[#allocation9 + $0x1a0] sm:$0xff] }
 0x141   : > { %3620 = vmatprep.subr.bf16.mxu1 %v4637_v8  ;;  %3438 = vmatmul.mubr.msk.f32.gmra.mrb[14].mxu0 %vm449_vm1, %v584_v57  ;;  %v3616_v45 = vpack.c.bf16 %v2318_v61, %v2317_v40 }
 0x142   : > { %3452 = vmatprep.mubr.msk.f32.mxu0 %vm449_vm1, %v4707_v48  ;;  %v597_v48 = vld [vmem:[#allocation2 + $0xc1] sm:$0xff] }
 0x143   : > { %3282 = vmatmul.mubr.msk.f32.gmra.mrb[6].mxu1 %vm449_vm1, %v4818_v39 }
 0x144   : > { %3284 = vmatprep.mubr.msk.f32.mxu1 %vm449_vm1, %v4822_v43 }
 0x145   : > { %3453 = vmatmul.mubr.msk.f32.vlgmr.msra.gmra.mrb[0].mxu0 %vm449_vm1, %v4714_v56  ;;  %v599_v56 = vld [vmem:[#allocation2 + $0xd9] sm:$0xff] }
 0x146   : > { %3611 = vmatpush3.bf16.msra.mxu0 %v3608_v29  ;;  %3455 = vmatprep.mubr.msk.f32.mxu0 %vm449_vm1, %v4724_v58  ;;  %v600_v58 = vld [vmem:[#allocation2 + $0xe1] sm:$0xff] }
 0x147   : > { %3285 = vmatmul.mubr.msk.f32.gmra.mrb[8].mxu1 %vm449_vm1, %v4840_v51  ;;  %3613 = vmatprep.subr.bf16.mxu0 %v3612_v10 }
 0x148   : > { %3287 = vmatprep.mubr.msk.f32.mxu1 %vm449_vm1, %v4843_v53 }
 0x149   : > { %3456 = vmatmul.mubr.msk.f32.gmra.mrb[2].mxu0 %vm449_vm1, %v4743_v1 }
 0x14a   : > { %3458 = vmatprep.mubr.msk.f32.mxu0 %vm449_vm1, %v4747_v2  ;;  %3615 = vmatpush3.bf16.msra.mxu0 %v3612_v10 }
 0x14b   : > { %3288 = vmatmul.mubr.msk.f32.gmra.mrb[10].mxu1 %vm449_vm1, %v4854_v62  ;;  %3617 = vmatprep.subr.bf16.mxu0 %v3616_v45 }
 0x14c   : > { %3290 = vmatprep.mubr.msk.f32.mxu1 %vm449_vm1, %v4858_v4 }
 0x14d   : > { %3459 = vmatmul.mubr.msk.f32.gmra.mrb[4].mxu0 %vm449_vm1, %v4760_v7 }
 0x14e   : > { %3461 = vmatprep.mubr.msk.f32.mxu0 %vm449_vm1, %v4783_v16  ;;  %3619 = vmatpush3.bf16.msra.mxu0 %v3616_v45 }
 0x14f   : > { %3291 = vmatmul.mubr.msk.f32.gmra.mrb[12].mxu1 %vm449_vm1, %v4868_v17 }
 0x150   : > { %3293 = vmatprep.mubr.msk.f32.mxu1 %vm449_vm1, %v4874_v21 }
 0x151   : > { %3462 = vmatmul.mubr.msk.f32.gmra.mrb[6].mxu0 %vm449_vm1, %v4798_v22 }
 0x152   : > { %3464 = vmatprep.mubr.msk.f32.mxu0 %vm449_vm1, %v4804_v26 }
 0x153   : > { %3294 = vmatmul.mubr.msk.f32.gmra.mrb[14].mxu1 %vm449_vm1, %v4886_v36 }
 0x154   : > { %3308 = vmatprep.mubr.msk.f32.mxu1 %vm449_vm1, %v4856_v63 }
 0x155   : > { %3465 = vmatmul.mubr.msk.f32.gmra.mrb[8].mxu0 %vm449_vm1, %v4816_v37 }
 0x156   : > { %3467 = vmatprep.mubr.msk.f32.mxu0 %vm449_vm1, %v4820_v42 }
 0x157   : > { %3309 = vmatmul.mubr.msk.f32.vlgmr.msra.gmra.mrb[0].mxu1 %vm449_vm1, %v4866_v11 }
 0x158   : > { %3623 = vmatpush3.bf16.msra.mxu1 %v4637_v8  ;;  %3311 = vmatprep.mubr.msk.f32.mxu1 %vm449_vm1, %v4872_v19  ;;  %v598_v8 = vld [vmem:[#allocation2 + $0xc9] sm:$0xff] }
 0x159   : > { %3621 = vmatprep.subr.bf16.mxu1 %v4639_v14  ;;  %3468 = vmatmul.mubr.msk.f32.gmra.mrb[10].mxu0 %vm449_vm1, %v4838_v50 }
 0x15a   : > { %3470 = vmatprep.mubr.msk.f32.mxu0 %vm449_vm1, %v597_v48 }
 0x15b   : > { %3312 = vmatmul.mubr.msk.f32.gmra.mrb[2].mxu1 %vm449_vm1, %v4884_v35 }
 0x15c   : > { %3314 = vmatprep.mubr.msk.f32.mxu1 %vm449_vm1, %v4888_v44  ;;  %3624 = vmatpush3.bf16.msra.mxu1 %v4639_v14  ;;  %v615_v14 = vld [vmem:[#allocation2 + $0xda] sm:$0xff] }
 0x15d   : > { %3622 = vmatprep.subr.bf16.mxu1 %v4656_v25  ;;  %3471 = vmatmul.mubr.msk.f32.gmra.mrb[12].mxu0 %vm449_vm1, %v598_v8 }
 0x15e   : > { %3473 = vmatprep.mubr.msk.f32.mxu0 %vm449_vm1, %v599_v56 }
 0x15f   : > { %3315 = vmatmul.mubr.msk.f32.gmra.mrb[4].mxu1 %vm449_vm1, %v4900_v49 }
 0x160   : > { %3317 = vmatprep.mubr.msk.f32.mxu1 %vm449_vm1, %v4904_v54  ;;  %3625 = vmatpush3.bf16.msra.mxu1 %v4656_v25  ;;  %v616_v25 = vld [vmem:[#allocation2 + $0xe2] sm:$0xff] }
 0x161   : > { %3474 = vmatmul.mubr.msk.f32.gmra.mrb[14].mxu0 %vm449_vm1, %v600_v58 }
 0x162   : > { %3488 = vmatprep.mubr.msk.f32.mxu0 %vm449_vm1, %v4789_v18 }
 0x163   : > { %3318 = vmatmul.mubr.msk.f32.gmra.mrb[6].mxu1 %vm449_vm1, %v4914_v3 }
 0x164   : > { %3320 = vmatprep.mubr.msk.f32.mxu1 %vm449_vm1, %v4916_v5 }
 0x165   : > { %3489 = vmatmul.mubr.msk.f32.vlgmr.msra.gmra.mrb[0].mxu0 %vm449_vm1, %v4800_v23  ;;  %v5118_v23 = vld [vmem:[%s5382_s3] ss:$0 sm:$0xff] }
 0x166   : > { %3491 = vmatprep.mubr.msk.f32.mxu0 %vm449_vm1, %v4806_v27 }
 0x167   : > { %3321 = vmatmul.mubr.msk.f32.gmra.mrb[8].mxu1 %vm449_vm1, %v4925_v30 }
 0x168   : > { %3323 = vmatprep.mubr.msk.f32.mxu1 %vm449_vm1, %v4929_v13 }
 0x169   : > { %3492 = vmatmul.mubr.msk.f32.gmra.mrb[2].mxu0 %vm449_vm1, %v4818_v39 }
 0x16a   : > { %3494 = vmatprep.mubr.msk.f32.mxu0 %vm449_vm1, %v4822_v43 }
 0x16b   : > { %3324 = vmatmul.mubr.msk.f32.gmra.mrb[10].mxu1 %vm449_vm1, %v4939_v15 }
 0x16c   : > { %3326 = vmatprep.mubr.msk.f32.mxu1 %vm449_vm1, %v4941_v59 }
 0x16d   : > { %3495 = vmatmul.mubr.msk.f32.gmra.mrb[4].mxu0 %vm449_vm1, %v4840_v51 }
 0x16e   : > { %3497 = vmatprep.mubr.msk.f32.mxu0 %vm449_vm1, %v4843_v53 }
 0x16f   : > { %3327 = vmatmul.mubr.msk.f32.gmra.mrb[12].mxu1 %vm449_vm1, %v4951_v6 }
 0x170   : > { %3329 = vmatprep.mubr.msk.f32.mxu1 %vm449_vm1, %v4967_v0 }
 0x171   : > { %3498 = vmatmul.mubr.msk.f32.gmra.mrb[6].mxu0 %vm449_vm1, %v4854_v62 }
 0x172   : > { %3500 = vmatprep.mubr.msk.f32.mxu0 %vm449_vm1, %v4858_v4 }
 0x173   : > { %3330 = vmatmul.mubr.msk.f32.gmra.mrb[14].mxu1 %vm449_vm1, %v4977_v55 }
 0x174   : > { %3356 = vmatprep.mubr.msk.f32.mxu1 %vm449_vm1, %v4783_v16 }
 0x175   : > { %3501 = vmatmul.mubr.msk.f32.gmra.mrb[8].mxu0 %vm449_vm1, %v4868_v17 }
 0x176   : > { %3503 = vmatprep.mubr.msk.f32.mxu0 %vm449_vm1, %v4874_v21 }
 0x177   : > { %3357 = vmatmul.mubr.msk.f32.vlgmr.msra.gmra.mrb[8].mxu1 %vm449_vm1, %v4798_v22 }
 0x178   : > { %3359 = vmatprep.mubr.msk.f32.mxu1 %vm449_vm1, %v4804_v26 }
 0x179   : > { %3504 = vmatmul.mubr.msk.f32.gmra.mrb[10].mxu0 %vm449_vm1, %v4886_v36 }
 0x17a   : > { %3506 = vmatprep.mubr.msk.f32.mxu0 %vm449_vm1, %v4890_v46 }
 0x17b   : > { %3360 = vmatmul.mubr.msk.f32.gmra.mrb[10].mxu1 %vm449_vm1, %v4816_v37 }
 0x17c   : > { %3362 = vmatprep.mubr.msk.f32.mxu1 %vm449_vm1, %v4820_v42 }
 0x17d   : > { %3507 = vmatmul.mubr.msk.f32.gmra.mrb[12].mxu0 %vm449_vm1, %v4902_v52 }
 0x17e   : > { %3509 = vmatprep.mubr.msk.f32.mxu0 %vm449_vm1, %v615_v14 }
 0x17f   : > { %3363 = vmatmul.mubr.msk.f32.gmra.mrb[12].mxu1 %vm449_vm1, %v4838_v50 }
 0x180   : > { %3365 = vmatprep.mubr.msk.f32.mxu1 %vm449_vm1, %v597_v48 }
 0x181   : > { %3510 = vmatmul.mubr.msk.f32.gmra.mrb[14].mxu0 %vm449_vm1, %v616_v25 }
 0x183   : > { %3366 = vmatmul.mubr.msk.f32.gmra.mrb[14].mxu1 %vm449_vm1, %v598_v8 }
 0x22a   : > { %v3310_v59 = vpop.f32.mrb[0].mxu1 }
 0x22b   : > { %v1353_v1 = vpop.f32.mrb[1].mxu1 }
 0x22e   : > { %v3313_v2 = vpop.f32.mrb[2].mxu1 }
 0x22f   : > { %v1363_v7 = vpop.f32.mrb[3].mxu1 }
 0x232   : > { %v3316_v13 = vpop.f32.mrb[4].mxu1 }
 0x233   : > { %v1373_v15 = vpop.f32.mrb[5].mxu1 }
 0x236   : > { %v3319_v16 = vpop.f32.mrb[6].mxu1 }
 0x237   : > { %v1383_v18 = vpop.f32.mrb[7].mxu1 }
 0x238   : > { %v3490_v22 = vpop.f32.mrb[0].mxu0 }
 0x239   : > { %v3626_v26 = vadd.f32 %v3490_v22, %v3310_v59  ;;  %v2433_v27 = vpop.f32.mrb[1].mxu0  ;;  %v5383_v22 = vld [vmem:[#allocation33_spill] sm:$0xff] }
 0x23a   : > { %v3627_v37 = vadd.f32 %v2433_v27, %v1353_v1 }
 0x23b   : > { %v2536_v39 = vadd.f32 %v3626_v26, %v5118_v23 }
 0x23c   : > { %v2535_v42 = vadd.f32 %v3627_v37, %v5118_v23  ;;  %v3493_v43 = vpop.f32.mrb[2].mxu0 }
 0x23d   : > { %v2552_v50 = vadd.f32 %v2536_v39, %v4653_v24  ;;  %v3628_v51 = vadd.f32 %v3493_v43, %v3313_v2  ;;  %v2443_v53 = vpop.f32.mrb[3].mxu0 }
 0x23e   : > { %v2551_v62 = vadd.f32 %v2535_v42, %v4647_v20  ;;  %v3629_v63 = vadd.f32 %v2443_v53, %v1363_v7  ;;  %v5385_v53 = vld [vmem:[#allocation35_spill] sm:$0xff] }
 0x23f   : > { %vm2568_vm2 = vcmp.ge.f32.partialorder %v2552_v50, 0.0  ;;  %v2584_v4 = vmul.f32 0.2, %v2552_v50  ;;  %v2538_v11 = vadd.f32 %v3628_v51, %v5118_v23 }
 0x240   : > { %vm2567_vm3 = vcmp.ge.f32.partialorder %v2551_v62, 0.0  ;;  %v2583_v17 = vmul.f32 0.2, %v2551_v62  ;;  %v2537_v19 = vadd.f32 %v3629_v63, %v5118_v23  ;;  %v3496_v21 = vpop.f32.mrb[4].mxu0 }
 0x241   : > { %v2600_v35 = vsel %vm2568_vm2, %v2552_v50, %v2584_v4  ;;  %v2554_v36 = vadd.f32 %v2538_v11, %v4668_v31  ;;  %v3630_v44 = vadd.f32 %v3496_v21, %v3316_v13  ;;  %v2453_v24 = vpop.f32.mrb[5].mxu0 }
 0x242   : > { %2616 = vst.msk [vmem:[%s5129_s20 + $0x8] sm:$0xff] %vm449_vm1, %v2600_v35  ;;  %v2599_v20 = vsel %vm2567_vm3, %v2551_v62, %v2583_v17  ;;  %v2553_v46 = vadd.f32 %v2537_v19, %v4661_v28  ;;  %v3631_v49 = vadd.f32 %v2453_v24, %v1373_v15  ;;  %v5386_v19 = vld [vmem:[#allocation34_spill] sm:$0xff] }
 0x243   : > { %2615 = vst.msk [vmem:[%s5129_s20] sm:$0xff] %vm449_vm1, %v2599_v20  ;;  %vm2570_vm4 = vcmp.ge.f32.partialorder %v2554_v36, 0.0  ;;  %v2586_v52 = vmul.f32 0.2, %v2554_v36  ;;  %v2540_v31 = vadd.f32 %v3630_v44, %v5118_v23 }
 0x244   : > { %vm2569_vm5 = vcmp.ge.f32.partialorder %v2553_v46, 0.0  ;;  %v2585_v54 = vmul.f32 0.2, %v2553_v46  ;;  %v2539_v3 = vadd.f32 %v3631_v49, %v5118_v23  ;;  %v3499_v5 = vpop.f32.mrb[6].mxu0 }
 0x245   : > { %v2602_v30 = vsel %vm2570_vm4, %v2554_v36, %v2586_v52  ;;  %v2556_v29 = vadd.f32 %v2540_v31, %v4676_v33  ;;  %v3632_v6 = vadd.f32 %v3499_v5, %v3319_v16  ;;  %v2463_v60 = vpop.f32.mrb[7].mxu0  ;;  %v5387_v31 = vld [vmem:[#allocation37_spill] sm:$0xff] }
 0x246   : > { %2618 = vst.msk [vmem:[%s5129_s20 + $0x18] sm:$0xff] %vm449_vm1, %v2602_v30  ;;  %v2601_v28 = vsel %vm2569_vm5, %v2553_v46, %v2585_v54  ;;  %v2555_v0 = vadd.f32 %v2539_v3, %v4673_v32  ;;  %v3633_v55 = vadd.f32 %v2463_v60, %v1383_v18 }
 0x247   : > { %2617 = vst.msk [vmem:[%s5129_s20 + $0x10] sm:$0xff] %vm449_vm1, %v2601_v28  ;;  %vm2572_vm6 = vcmp.ge.f32.partialorder %v2556_v29, 0.0  ;;  %v2588_v9 = vmul.f32 0.2, %v2556_v29  ;;  %v2542_v57 = vadd.f32 %v3632_v6, %v5118_v23  ;;  %v5388_v6 = vld [vmem:[#allocation36_spill] sm:$0xff] }
 0x248   : > { %vm2571_vm7 = vcmp.ge.f32.partialorder %v2555_v0, 0.0  ;;  %v2587_v12 = vmul.f32 0.2, %v2555_v0  ;;  %v2541_v33 = vadd.f32 %v3633_v55, %v5118_v23  ;;  %v3502_v10 = vpop.f32.mrb[8].mxu0 }
 0x249   : > { %v2604_v40 = vsel %vm2572_vm6, %v2556_v29, %v2588_v9  ;;  %v2558_v61 = vadd.f32 %v2542_v57, %v4690_v38  ;;  %v2473_v48 = vpop.f32.mrb[9].mxu0 }
 0x24a   : > { %v3358_v47 = vpop.f32.mrb[8].mxu1  ;;  %2620 = vst.msk [vmem:[%s5129_s20 + $0x28] sm:$0xff] %vm449_vm1, %v2604_v40  ;;  %v2603_v8 = vsel %vm2571_vm7, %v2555_v0, %v2587_v12  ;;  %v2557_v56 = vadd.f32 %v2541_v33, %v4684_v34  ;;  %v5389_v33 = vld [vmem:[#allocation39_spill] sm:$0xff]  ;;  %v5390_v40 = vld [vmem:[#allocation38_spill] sm:$0xff] }
 0x24b   : > { %v3634_v45 = vadd.f32 %v3502_v10, %v3358_v47  ;;  %v1609_v32 = vpop.f32.mrb[9].mxu1  ;;  %2619 = vst.msk [vmem:[%s5129_s20 + $0x20] sm:$0xff] %vm449_vm1, %v2603_v8  ;;  %vm2574_vm8 = vcmp.ge.f32.partialorder %v2558_v61, 0.0  ;;  %v2590_v14 = vmul.f32 0.2, %v2558_v61 }
 0x24c   : > { %v3635_v58 = vadd.f32 %v2473_v48, %v1609_v32  ;;  %vm2573_vm9 = vcmp.ge.f32.partialorder %v2557_v56, 0.0  ;;  %v2589_v59 = vmul.f32 0.2, %v2557_v56  ;;  %v3505_v2 = vpop.f32.mrb[10].mxu0 }
 0x24d   : > { %v2544_v25 = vadd.f32 %v3634_v45, %v5118_v23  ;;  %v2606_v7 = vsel %vm2574_vm8, %v2558_v61, %v2590_v14  ;;  %v2483_v16 = vpop.f32.mrb[11].mxu0 }
 0x24e   : > { %v2543_v38 = vadd.f32 %v3635_v58, %v5118_v23  ;;  %v3361_v1 = vpop.f32.mrb[10].mxu1  ;;  %2622 = vst.msk [vmem:[%s5129_s20 + $0x38] sm:$0xff] %vm449_vm1, %v2606_v7  ;;  %v2605_v18 = vsel %vm2573_vm9, %v2557_v56, %v2589_v59 }
 0x24f   : > { %v2560_v13 = vadd.f32 %v2544_v25, %v4698_v41  ;;  %v3636_v15 = vadd.f32 %v3505_v2, %v3361_v1  ;;  %v1619_v34 = vpop.f32.mrb[11].mxu1  ;;  %2621 = vst.msk [vmem:[%s5129_s20 + $0x30] sm:$0xff] %vm449_vm1, %v2605_v18 }
 0x250   : > { %v2559_v26 = vadd.f32 %v2543_v38, %v5383_v22  ;;  %v3637_v27 = vadd.f32 %v2483_v16, %v1619_v34  ;;  %v3508_v50 = vpop.f32.mrb[12].mxu0 }
 0x251   : > { %vm2576_vm10 = vcmp.ge.f32.partialorder %v2560_v13, 0.0  ;;  %v2592_v37 = vmul.f32 0.2, %v2560_v13  ;;  %v2546_v39 = vadd.f32 %v3636_v15, %v5118_v23  ;;  %v2493_v11 = vpop.f32.mrb[13].mxu0 }
 0x252   : > { %vm2575_vm11 = vcmp.ge.f32.partialorder %v2559_v26, 0.0  ;;  %v2591_v42 = vmul.f32 0.2, %v2559_v26  ;;  %v2545_v41 = vadd.f32 %v3637_v27, %v5118_v23  ;;  %v3364_v43 = vpop.f32.mrb[12].mxu1 }
 0x253   : > { %v2608_v51 = vsel %vm2576_vm10, %v2560_v13, %v2592_v37  ;;  %v2562_v62 = vadd.f32 %v2546_v39, %v5385_v53  ;;  %v3638_v63 = vadd.f32 %v3508_v50, %v3364_v43  ;;  %v1629_v4 = vpop.f32.mrb[13].mxu1 }
 0x254   : > { %2624 = vst.msk [vmem:[%s5129_s20 + $0x48] sm:$0xff] %vm449_vm1, %v2608_v51  ;;  %v2607_v17 = vsel %vm2575_vm11, %v2559_v26, %v2591_v42  ;;  %v2561_v21 = vadd.f32 %v2545_v41, %v5386_v19  ;;  %v3639_v35 = vadd.f32 %v2493_v11, %v1629_v4  ;;  %v3511_v49 = vpop.f32.mrb[14].mxu0 }
 0x255   : > { %2623 = vst.msk [vmem:[%s5129_s20 + $0x40] sm:$0xff] %vm449_vm1, %v2607_v17  ;;  %vm2578_vm12 = vcmp.ge.f32.partialorder %v2562_v62, 0.0  ;;  %v2594_v36 = vmul.f32 0.2, %v2562_v62  ;;  %v2548_v44 = vadd.f32 %v3638_v63, %v5118_v23  ;;  %v2503_v30 = vpop.f32.mrb[15].mxu0 }
 0x256   : > { %vm2577_vm13 = vcmp.ge.f32.partialorder %v2561_v21, 0.0  ;;  %v2593_v24 = vmul.f32 0.2, %v2561_v21  ;;  %v2547_v20 = vadd.f32 %v3639_v35, %v5118_v23  ;;  %v3367_v46 = vpop.f32.mrb[14].mxu1 }
 0x257   : > { %v2610_v52 = vsel %vm2578_vm12, %v2562_v62, %v2594_v36  ;;  %v2564_v54 = vadd.f32 %v2548_v44, %v5387_v31  ;;  %v3640_v3 = vadd.f32 %v3511_v49, %v3367_v46  ;;  %v1639_v5 = vpop.f32.mrb[15].mxu1 }
 0x258   : > { %2626 = vst.msk [vmem:[%s5129_s20 + $0x58] sm:$0xff] %vm449_vm1, %v2610_v52  ;;  %v2609_v29 = vsel %vm2577_vm13, %v2561_v21, %v2593_v24  ;;  %v2563_v60 = vadd.f32 %v2547_v20, %v5388_v6  ;;  %v3641_v28 = vadd.f32 %v2503_v30, %v1639_v5 }
 0x259   : > { %2625 = vst.msk [vmem:[%s5129_s20 + $0x50] sm:$0xff] %vm449_vm1, %v2609_v29  ;;  %vm2580_vm14 = vcmp.ge.f32.partialorder %v2564_v54, 0.0  ;;  %v2596_v0 = vmul.f32 0.2, %v2564_v54  ;;  %v2550_v55 = vadd.f32 %v3640_v3, %v5118_v23 }
 0x25a   : > { %vm2579_vm15 = vcmp.ge.f32.partialorder %v2563_v60, 0.0  ;;  %v2595_v9 = vmul.f32 0.2, %v2563_v60  ;;  %v2549_v57 = vadd.f32 %v3641_v28, %v5118_v23 }
 0x25b   : > { %v2612_v12 = vsel %vm2580_vm14, %v2564_v54, %v2596_v0  ;;  %v2566_v47 = vadd.f32 %v2550_v55, %v5389_v33 }
 0x25c   : > { %2628 = vst.msk [vmem:[%s5129_s20 + $0x68] sm:$0xff] %vm449_vm1, %v2612_v12  ;;  %v2611_v10 = vsel %vm2579_vm15, %v2563_v60, %v2595_v9  ;;  %v2565_v61 = vadd.f32 %v2549_v57, %v5390_v40 }
 0x25d   : > { %2627 = vst.msk [vmem:[%s5129_s20 + $0x60] sm:$0xff] %vm449_vm1, %v2611_v10  ;;  %vm2582_vm0 = vcmp.ge.f32.partialorder %v2566_v47, 0.0  ;;  %v2598_v45 = vmul.f32 0.2, %v2566_v47 }
 0x25e   : > { %vm2581_vm2 = vcmp.ge.f32.partialorder %v2565_v61, 0.0  ;;  %v2597_v23 = vmul.f32 0.2, %v2565_v61 }
 0x25f   : > { %v2614_v32 = vsel %vm2582_vm0, %v2566_v47, %v2598_v45 }
 0x260   : > { %2630 = vst.msk [vmem:[%s5129_s20 + $0x78] sm:$0xff] %vm449_vm1, %v2614_v32  ;;  %v2613_v48 = vsel %vm2581_vm2, %v2565_v61, %v2597_v23 }
 0x261   : > { %2629 = vst.msk [vmem:[%s5129_s20 + $0x70] sm:$0xff] %vm449_vm1, %v2613_v48 }
 0x262   : > { %4037 = shalt.err (!%p4034_p0)
}
 0x263   : > { %s4038_s19 = scalar_lea.hbm %s5190_s18, 2048  ;;  %s4042_s21 = scalar_lea.hbm %s5392_s15, 8192 }
 0x264   : > { %p4039_p9 = scmp.ne.s32.totalorder %s5190_s18, %s4038_s19  ;;  %p4043_p10 = scmp.lt.u32.totalorder %s5190_s18, %s5392_s15 }
 0x265   : > { %p4044_p7 = scmp.lt.u32.totalorder %s4042_s21, %s4038_s19  ;;  %p4046_p13 = scmp.lt.u32.totalorder %s4038_s19, %s5190_s18 }
 0x266   : > { %p4040_p5 = pnand %p4039_p9, %p5393_p12 }
 0x267   : > { %p4045_p1 = por %p4044_p7, %p4043_p10 }
 0x268   : > { %p4041_p4 = pneg %p4040_p5 }
 0x269   : > { %p4047_p8 = por %p4046_p13, %p4045_p1 }
 0x26b   : > { %p4048_p11 = pnand %p4047_p8, %p4041_p4 }
 0x26d   : > { %4051 = shalt.err (!%p4048_p11)
}
 0x26e   : > { %s4192_s20 = smov 128   ;;  %s4193_s30 = smov 8  }
 0x26f   : > { %3764 = dma.vmem_to_hbm [thread:$0]  (%p5393_p12), %s5192_s2, 2048, %s5190_s18, %s2632_s4, %s4192_s20, %s4192_s20, %s4193_s30  }
 0x270 PF: > { %s5394_s9 = sld [smem:[#allocation32_spill]]  ;;  %p3787_p6 = scmp.ge.s32.totalorder %s4182_s6, 2 }
 0x271   : > { %s2663_s1 = sand.u32 1, %s4154_s24  }
 0x272   : > { %s2664_s11 = scalar_lea.sflag [#allocation5], %s2663_s1 }
 0x276   : > { %p5395_p2 = scmp.ne.s32.totalorder %s5394_s9, 0 }
 0x278   : > { %p3781_p3 = pnand %p3787_p6, %p5395_p2 }
 0x27a   : > { %4125 = dma.done.wait (!%p3781_p3), %s2664_s11, 2048  }
 0x27b   : > { %4127 = vsyncadd (!%p3781_p3), %s2664_s11, 4294965248  ;;  %s25_s6 = sadd.s32 1, %s4182_s6   ;;  %s5397_s18 = sld [smem:[#allocation18_spill]] }
 0x27c   : > { %p5227_p0 = scmp.ge.s32.totalorder %s25_s6, 6   ;;  %s5398_s19 = sld [smem:[#allocation19_spill]] }
 0x27d   : > { %s5399_s17 = sld [smem:[#allocation20_spill]]  ;;  %s5400_s23 = sld [smem:[#allocation30_spill]] }
 0x27e   : > { %s5401_s13 = sld [smem:[#allocation21_spill]]  ;;  %s5402_s26 = sld [smem:[#allocation31_spill]] }
 0x27f   : > { %s5403_s27 = sld [smem:[#allocation24_spill]]  ;;  %s5404_s28 = sld [smem:[#allocation25_spill]] }
 0x280   : > { %s5405_s29 = sld [smem:[#allocation26_spill]]  ;;  %s5406_s30 = sld [smem:[#allocation27_spill]] }
 0x281   : > { %s5407_s20 = smov %s5427_s12  ;;  %s5408_s21 = smov %s4146_s22 }
 0x282   : > { %s5410_s24 = smov %s4158_s25  ;;  %24 = sbr.rel (!%p5227_p0) target bundleno = 20 (0x14), region = 124 }
 0x283   : > { %s5409_s22 = smov %s5399_s17 }
 0x284   : > { %s5411_s25 = smov %s5401_s13 }
 0x289   :  { %2669 = vsyncpa [#allocation4], 1 }
 0x28a   :  { %2671 = vsyncpa [#allocation4 + $0x1], 1 }
 0x28b   :  { %2672 = vsyncpa [#allocation7], 1 }
 0x28c   :  { %2674 = vsyncpa [#allocation7 + $0x1], 1 }
 0x28d   :  { %2675 = vsyncpa [#allocation10], 1 }
 0x28e   :  { %2676 = vsyncpa [#allocation5], 1 }
 0x28f   :  { %2678 = vsyncpa [#allocation5 + $0x1], 1 }

</bundles_post_ra>
